<compile_context>
chip_gen: v5e
topology: v5e:2x2
jax: 0.10.0
libtpu: 0.0.40
codegen_flags: <defaults>
</compile_context>

<pallas_src>
import functools

import numpy as np
import jax
import jax.numpy as jnp
from jax.experimental import pallas as pl
from jax.experimental.pallas import tpu as pltpu


# ----------------------------------------------------------------------------
# Fused self-attention kernel (one grid step == one batch element)
# ----------------------------------------------------------------------------
def self_attention_kernel(x_ref, w_ref, b_ref, gamma_ref, o_ref, *, cqp, c):
    x = x_ref[...]                                     # (C, N), lane-dense

    # Fused q/k/v projection, channel-major: (2*cqp + C, C) @ (C, N).
    qkv = jnp.dot(w_ref[...], x, preferred_element_type=jnp.float32) + b_ref[...]
    q = qkv[:cqp, :]                                   # (cqp, N)
    k = qkv[cqp:2 * cqp, :]                            # (cqp, N)
    v = qkv[2 * cqp:, :]                               # (C,  N)

    # Attention logits s[i, j] = q_i . k_j  (contract the channel/sublane dim).
    s = jax.lax.dot_general(q, k, (((0,), (0,)), ((), ())),
                            preferred_element_type=jnp.float32)      # (N, N)

    # Row softmax (reduction over the lane axis); approx reciprocal -> EUP.
    s = s - jnp.max(s, axis=-1, keepdims=True)
    p = jnp.exp(s)
    a = p * pl.reciprocal(jnp.sum(p, axis=-1, keepdims=True), approx=True)

    # y[c, i] = sum_j v[c, j] * a[i, j]  (contract dim 1 of both -> (C, N)).
    y = jax.lax.dot_general(v, a, (((1,), (1,)), ((), ())),
                            preferred_element_type=jnp.float32)      # (C, N)

    # Residual epilogue; result is already channel-major, lane-dense.
    o_ref[...] = x + gamma_ref[0] * y


# ----------------------------------------------------------------------------
# Wrapper
# ----------------------------------------------------------------------------
def self_attention_forward(x, wq, bq, wk, bk, wv, bv, gamma):
    """Forward of SelfAttention(in_dim, rate) for NCHW x.
    wq/wk: (in_dim//rate, in_dim), wv: (in_dim, in_dim) -- 1x1 conv weights."""
    B, C, H, W = x.shape
    N = H * W
    cq = wq.shape[0]

    # f32 tile constraints (see correctness notes): handled for these sizes.
    assert C % 8 == 0, "in_dim must be a multiple of 8 (or pad in wrapper)"
    assert N % 128 == 0, "H*W must be a multiple of 128 (or pad in wrapper)"

    # Pad q/k output channels up to 8 sublanes with zeros (weights AND biases)
    # and fuse [Wq_pad; Wk_pad; Wv] into a single projection matrix.
    cqp = max(8, ((cq + 7) // 8) * 8)
    ctot = 2 * cqp + C

    w_fused = jnp.zeros((ctot, C), jnp.float32)
    w_fused = w_fused.at[:cq, :].set(wq.astype(jnp.float32))
    w_fused = w_fused.at[cqp:cqp + cq, :].set(wk.astype(jnp.float32))
    w_fused = w_fused.at[2 * cqp:, :].set(wv.astype(jnp.float32))

    b_fused = jnp.zeros((ctot, 1), jnp.float32)
    b_fused = b_fused.at[:cq, 0].set(bq.astype(jnp.float32))
    b_fused = b_fused.at[cqp:cqp + cq, 0].set(bk.astype(jnp.float32))
    b_fused = b_fused.at[2 * cqp:, 0].set(bv.astype(jnp.float32))

    gamma_arr = jnp.asarray(gamma, jnp.float32).reshape(1)

    xf = x.reshape(B, C, N)                            # free reshape, NCHW kept

    kernel = functools.partial(self_attention_kernel, cqp=cqp, c=C)

    out = pl.pallas_call(
        kernel,
        grid=(B,),
        in_specs=[
            pl.BlockSpec((None, C, N), lambda b: (b, 0, 0)),       # x[b]  (C, N)
            pl.BlockSpec((ctot, C), lambda b: (0, 0)),             # fused W
            pl.BlockSpec((ctot, 1), lambda b: (0, 0)),             # fused bias
            pl.BlockSpec((1,), lambda b: (0,),
                         memory_space=pltpu.MemorySpace.SMEM),     # gamma scalar
        ],
        out_specs=pl.BlockSpec((None, C, N), lambda b: (b, 0, 0)),
        out_shape=jax.ShapeDtypeStruct((B, C, N), jnp.float32),
        compiler_params=pltpu.CompilerParams(
            dimension_semantics=("parallel",)),
    )(xf, w_fused, b_fused, gamma_arr)

    return out.reshape(B, C, H, W)


# ----------------------------------------------------------------------------
# Parameter init (mimics nn.Conv2d defaults; kernel_size=1)
# ----------------------------------------------------------------------------
def init_params(key, in_dim, rate):
    cq = in_dim // rate
    ks = jax.random.split(key, 6)

    def conv_init(kw_, kb_, out_c, in_c):
        bound = 1.0 / float(np.sqrt(in_c))
        w = jax.random.uniform(kw_, (out_c, in_c), jnp.float32,
                               minval=-bound, maxval=bound)
        b = jax.random.uniform(kb_, (out_c,), jnp.float32,
                               minval=-bound, maxval=bound)
        return w, b

    wq, bq = conv_init(ks[0], ks[1], cq, in_dim)
    wk, bk = conv_init(ks[2], ks[3], cq, in_dim)
    wv, bv = conv_init(ks[4], ks[5], in_dim, in_dim)
    return wq, bq, wk, bk, wv, bv


# ----------------------------------------------------------------------------
# Pure-JAX reference (mirrors the PyTorch forward exactly)
# ----------------------------------------------------------------------------
def reference_forward(x, wq, bq, wk, bk, wv, bv, gamma):
    B, C, H, W = x.shape
    N = H * W
    xf = x.reshape(B, C, N)
    q = jnp.einsum('oc,bcn->bon', wq, xf) + bq[None, :, None]
    k = jnp.einsum('oc,bcn->bon', wk, xf) + bk[None, :, None]
    v = jnp.einsum('oc,bcn->bon', wv, xf) + bv[None, :, None]
    s = jnp.einsum('bci,bcj->bij', q, k)          # (B, N, N)
    a = jax.nn.softmax(s, axis=-1)
    y = jnp.einsum('bcj,bij->bci', v, a)          # (B, C, N)
    return (xf + gamma * y).reshape(B, C, H, W)


if __name__ == "__main__":
    key = jax.random.PRNGKey(0)
    k_x, k_p = jax.random.split(key)

    # in_dim must be >= rate for the q/k bottleneck; spatial 16x16 -> N=256.
    B, in_dim, H, W = 2, 32, 16, 16
    rate = 16

    x = jax.random.normal(k_x, (B, in_dim, H, W), jnp.float32)
    wq, bq, wk, bk, wv, bv = init_params(k_p, in_dim, rate)
    # The module initializes gamma to 0.0 (identity); use a nonzero value here
    # so the attention path is actually exercised by the check.
    gamma = jnp.float32(0.5)
    # Note: self.act is defined in the PyTorch __init__ but never used in
    # forward, so it is intentionally omitted.

    out = self_attention_forward(x, wq, bq, wk, bk, wv, bv, gamma)
    out = jax.block_until_ready(out)

    ref = reference_forward(x, wq, bq, wk, bk, wv, bv, gamma)
    np.testing.assert_allclose(np.asarray(out), np.asarray(ref),
                               rtol=1e-3, atol=1e-3)
    print("KERNEL_OK")
</pallas_src>

<mosaic_0001>
module attributes {stable_mosaic.version = 11 : i64} {
  func.func @self_attention_kernel(%arg0: i32, %arg1: memref<1x32x256xf32, #tpu.memory_space<vmem>>, %arg2: memref<48x32xf32, #tpu.memory_space<vmem>>, %arg3: memref<48x1xf32, #tpu.memory_space<vmem>>, %arg4: memref<1xf32, #tpu.memory_space<smem>>, %arg5: memref<1x32x256xf32, #tpu.memory_space<vmem>>) attributes {dimension_semantics = [#tpu.dimension_semantics<parallel>], iteration_bounds = array<i64: 2>, scalar_prefetch = 0 : i64, scratch_operands = 0 : i64, tpu.core_type = #tpu.core_type<tc>, window_params = [{transform_indices = @transform_0, window_bounds = array<i64: 1, 32, 256>}, {pipeline_mode = #tpu.pipeline_mode<synchronous>, transform_indices = @transform_1, window_bounds = array<i64: 48, 32>}, {pipeline_mode = #tpu.pipeline_mode<synchronous>, transform_indices = @transform_2, window_bounds = array<i64: 48, 1>}, {transform_indices = @transform_3, window_bounds = array<i64: 1>}, {transform_indices = @transform_4, window_bounds = array<i64: 1, 32, 256>}]} {
    %c0 = arith.constant 0 : index
    %c0_0 = arith.constant 0 : index
    %c0_1 = arith.constant 0 : index
    %0 = vector.load %arg1[%c0, %c0_0, %c0_1] : memref<1x32x256xf32, #tpu.memory_space<vmem>>, vector<1x32x256xf32>
    %1 = vector.shape_cast %0 : vector<1x32x256xf32> to vector<32x256xf32>
    %c0_2 = arith.constant 0 : index
    %c0_3 = arith.constant 0 : index
    %2 = vector.load %arg2[%c0_2, %c0_3] : memref<48x32xf32, #tpu.memory_space<vmem>>, vector<48x32xf32>
    %cst = arith.constant dense<0.000000e+00> : vector<48x256xf32>
    %3 = tpu.matmul %2, %1, %cst {dimension_numbers = #tpu.dot_dimension_numbers<[1], [0], [0], [1], [0, 0, 1, 1], [], []>} : vector<48x32xf32>, vector<32x256xf32>, vector<48x256xf32> -> vector<48x256xf32>
    %c0_4 = arith.constant 0 : index
    %c0_5 = arith.constant 0 : index
    %4 = vector.load %arg3[%c0_4, %c0_5] : memref<48x1xf32, #tpu.memory_space<vmem>>, vector<48x1xf32>
    %5 = vector.broadcast %4 : vector<48x1xf32> to vector<48x256xf32>
    %6 = arith.addf %3, %5 : vector<48x256xf32>
    %7 = vector.extract_strided_slice %6 {offsets = [0, 0], sizes = [8, 256], strides = [1, 1]} : vector<48x256xf32> to vector<8x256xf32>
    %8 = vector.extract_strided_slice %6 {offsets = [8, 0], sizes = [8, 256], strides = [1, 1]} : vector<48x256xf32> to vector<8x256xf32>
    %9 = vector.extract_strided_slice %6 {offsets = [16, 0], sizes = [32, 256], strides = [1, 1]} : vector<48x256xf32> to vector<32x256xf32>
    %cst_6 = arith.constant dense<0.000000e+00> : vector<256x256xf32>
    %10 = tpu.matmul %7, %8, %cst_6 {dimension_numbers = #tpu.dot_dimension_numbers<[0], [0], [1], [1], [0, 1, 1, 1], [], []>} : vector<8x256xf32>, vector<8x256xf32>, vector<256x256xf32> -> vector<256x256xf32>
    %cst_7 = arith.constant dense<0xFF800000> : vector<256xf32>
    %11 = vector.multi_reduction <maximumf>, %10, %cst_7 [1] : vector<256x256xf32> to vector<256xf32>
    %12 = vector.shape_cast %11 : vector<256xf32> to vector<256x1xf32>
    %13 = vector.broadcast %12 : vector<256x1xf32> to vector<256x256xf32>
    %14 = arith.subf %10, %13 : vector<256x256xf32>
    %15 = math.exp %14 : vector<256x256xf32>
    %cst_8 = arith.constant dense<0.000000e+00> : vector<256xf32>
    %16 = vector.multi_reduction <add>, %15, %cst_8 [1] : vector<256x256xf32> to vector<256xf32>
    %17 = vector.shape_cast %16 : vector<256xf32> to vector<256x1xf32>
    %18 = tpu.reciprocal %17 {approx = true} : vector<256x1xf32> -> vector<256x1xf32>
    %19 = vector.broadcast %18 : vector<256x1xf32> to vector<256x256xf32>
    %20 = arith.mulf %15, %19 : vector<256x256xf32>
    %cst_9 = arith.constant dense<0.000000e+00> : vector<32x256xf32>
    %21 = tpu.matmul %9, %20, %cst_9 {dimension_numbers = #tpu.dot_dimension_numbers<[1], [1], [0], [0], [0, 0, 1, 0], [], []>} : vector<32x256xf32>, vector<256x256xf32>, vector<32x256xf32> -> vector<32x256xf32>
    %c0_10 = arith.constant 0 : index
    %22 = memref.load %arg4[%c0_10] : memref<1xf32, #tpu.memory_space<smem>>
    %23 = vector.broadcast %22 : f32 to vector<32x256xf32>
    %24 = arith.mulf %23, %21 : vector<32x256xf32>
    %25 = arith.addf %1, %24 : vector<32x256xf32>
    %c0_11 = arith.constant 0 : index
    %c0_12 = arith.constant 0 : index
    %c0_13 = arith.constant 0 : index
    %26 = vector.load %arg5[%c0_11, %c0_12, %c0_13] : memref<1x32x256xf32, #tpu.memory_space<vmem>>, vector<1x32x256xf32>
    %27 = vector.shape_cast %26 : vector<1x32x256xf32> to vector<32x256xf32>
    %28 = vector.shape_cast %25 : vector<32x256xf32> to vector<1x32x256xf32>
    tpu.vector_store %arg5[%c0_11, %c0_12, %c0_13], %28 {strides = array<i32>} : memref<1x32x256xf32, #tpu.memory_space<vmem>>, vector<1x32x256xf32>,
    return
  }
  func.func @transform_0(%arg0: i32) -> (i32, i32, i32) {
    %c0_i32 = arith.constant 0 : i32
    %c0_i32_0 = arith.constant 0 : i32
    %c0_i32_1 = arith.constant 0 : i32
    return %arg0, %c0_i32, %c0_i32_0 : i32, i32, i32
  }
  func.func @transform_1(%arg0: i32) -> (i32, i32) {
    %c0_i32 = arith.constant 0 : i32
    %c0_i32_0 = arith.constant 0 : i32
    %c0_i32_1 = arith.constant 0 : i32
    return %c0_i32, %c0_i32_0 : i32, i32
  }
  func.func @transform_2(%arg0: i32) -> (i32, i32) {
    %c0_i32 = arith.constant 0 : i32
    %c0_i32_0 = arith.constant 0 : i32
    %c0_i32_1 = arith.constant 0 : i32
    return %c0_i32, %c0_i32_0 : i32, i32
  }
  func.func @transform_3(%arg0: i32) -> i32 {
    %c0_i32 = arith.constant 0 : i32
    %c0_i32_0 = arith.constant 0 : i32
    return %c0_i32 : i32
  }
  func.func @transform_4(%arg0: i32) -> (i32, i32, i32) {
    %c0_i32 = arith.constant 0 : i32
    %c0_i32_0 = arith.constant 0 : i32
    %c0_i32_1 = arith.constant 0 : i32
    return %arg0, %c0_i32, %c0_i32_0 : i32, i32, i32
  }
}

</mosaic_0001>

<bundles_post_ra>
// kernel: tpu_custom_call.1
= control target key start
LH: loop header
LB: loop body
LE: loop exit
PB: predicated region body
PF: predicated region fallthrough
CT: control target
= control target key end

     0   :  { %s2759_s0 = inlined_call_operand.vmem [shape: f32[2,32,256], index: 0, kind: input, shape index: {}]   ;;  %s2760_s1 = inlined_call_operand.vmem [shape: f32[48,32], index: 1, kind: input, shape index: {}]   ;;  %s2761_s2 = inlined_call_operand.vmem [shape: f32[48,1], index: 2, kind: input, shape index: {}]   ;;  %s2762_s3 = inlined_call_operand.<no memory space> [shape: f32[1], index: 3, kind: input, shape index: {}]   ;;  %s2763_s4 = inlined_call_operand.hbm [shape: f32[2,32,256], index: 4, kind: output, shape index: {}]  }
   0x1   :  { %9 = sst [smem:[#allocation2]] %s2762_s3 }
   0x2   :  { %10 = vsyncpa [#allocation4], 0 }
   0x3   :  { %12 = vsyncpa [#allocation4 + $0x1], 0  ;;  %s1853_s17 = smov 0   ;;  %s1855_s18 = smov 0  }
   0x4   :  { %s1857_s19 = smov 0   ;;  %s1859_s20 = smov 0  }
   0x5 LB: > { %s1874_s3 = sadd.s32 4294967295, %s1820_s20   ;;  %s1423_s21 = sadd.s32 4294967294, %s1820_s20   ;;  %s1820_s20 = sphi %s1859_s20, %s2886_s20   ;;  %s1816_s19 = sphi %s1857_s19, %s2885_s19   ;;  %s1812_s18 = sphi %s1855_s18, %s2884_s18   ;;  %s1808_s17 = sphi %s1853_s17, %s2883_s17  }
   0x6   : > { %s1878_s22 = sadd.s32 1, %s1820_s20   ;;  %s114_s23 = sadd.s32 1, %s1816_s19 }
   0x7   : > { %s111_s24 = ssub.s32 %s1820_s20, %s1878_s22  ;;  %p124_p0 = scmp.ne.s32.totalorder %s1816_s19, %s1812_s18 }
   0x8   : > { %p112_p1 = scmp.eq.s32.totalorder %s111_s24, 0  ;;  %p125_p2 = scmp.eq.s32.totalorder %s1874_s3, 1 }
   0x9   : > { %p130_p3 = scmp.ne.s32.totalorder %s1812_s18, %s1808_s17  ;;  %p131_p4 = scmp.eq.s32.totalorder %s1423_s21, 1 }
   0xa   : > { %s1889_s25 = scalar_select %p112_p1, %s1816_s19, %s114_s23  }
   0xb   : > { %p1891_p5 = por %p125_p2, %p124_p0  ;;  %p1895_p6 = por %p131_p4, %p130_p3 }
   0xc   : > { %p1426_p7 = scmp.ge.s32.totalorder %s1820_s20, 1  ;;  %p166_p8 = scmp.lt.s32.totalorder %s1820_s20, 3 }
   0xe   : > { %p167_p9 = pnand %p1426_p7, %p166_p8 }
  0x10   : > { %170 = sbr.rel (%p167_p9) target bundleno = 1357 (0x54d), region = 36 }
  0x15   : > { %p192_p10 = scmp.lt.s32.totalorder %s1874_s3, 1  ;;  %v211_v0 = vld [vmem:[%s2761_s2] sm:$0xff]  ;;  %v1822_v1 = vmov 0   ;;  %v212_v6 = vld [vmem:[%s2761_s2 + $0x8] sm:$0xff]  ;;  %vm247_vm0 = vcmask 261120   ;;  %vm400_vm1 = vcmask 64512  }
  0x16   : > { %1556 = vset.pattern.permute.xlu0 %v1822_v1  ;;  %1557 = vset.pattern.permute.xlu2 %v1822_v1  ;;  %v205_v11 = vld [vmem:[%s2760_s1] sm:$0xff]  ;;  %v206_v12 = vld [vmem:[%s2760_s1 + $0x8] sm:$0xff]  ;;  %s1319_s14 = sld [smem:[#allocation2]]  ;;  %s189_s15 = sand.u32 1, %s1812_s18  }
  0x17   : > { %s193_s30 = scalar_select %p192_p10, %s1874_s3, 1  ;;  %219 = vperm.xlu0 %1556, %v211_v0  }
  0x18   : > { %s1427_s16 = sshll.u32 %s189_s15, 6  ;;  %s1512_s23 = sshll.u32 %s1874_s3, 6 }
  0x19   : > { %s1511_s5 = sshll.u32 %s193_s30, 6  ;;  %s2691_s21 = scalar_lea.vmem [#allocation3], %s1427_s16 }
  0x1a   : > { %s1909_s8 = scalar_lea.vmem %s2759_s0, %s1511_s5  ;;  %s1357_s29 = scalar_lea.hbm %s2763_s4, %s1512_s23 }
  0x1b   : > { %v203_v2 = vld [vmem:[%s1909_s8 + $0x30] sm:$0xff]  ;;  %v204_v3 = vld [vmem:[%s1909_s8 + $0x38] sm:$0xff]  ;;  %v201_v4 = vld [vmem:[%s1909_s8 + $0x20] sm:$0xff]  ;;  %s1358_s30 = sshll.u32 %s2691_s21, 4  ;;  %s1360_s5 = sshll.u32 %s1357_s29, 4  ;;  %s1359_s30 = int_to_ptr.vmem [resolvable:$true] %s1358_s30  ;;  %s1361_s5 = int_to_ptr.hbm [resolvable:$true] %s1360_s5 }
  0x1c   : > { %278 = vmatpush.msra.mxu0 %v203_v2  ;;  %313 = vmatpush.msra.mxu1 %v204_v3  ;;  %v202_v5 = vld [vmem:[%s1909_s8 + $0x28] sm:$0xff]  ;;  %v199_v7 = vld [vmem:[%s1909_s8 + $0x10] sm:$0xff]  ;;  %v200_v8 = vld [vmem:[%s1909_s8 + $0x18] sm:$0xff]  ;;  %s1346_s3 = scalar_lea.sflag [#allocation4], %s189_s15  ;;  %s1772_s6 = sshra.s32 %s1361_s5, 4  ;;  %s1773_s6 = int_to_ptr.hbm [resolvable:$true] %s1772_s6 }
  0x1d   : > { %v197_v9 = vld [vmem:[%s1909_s8] sm:$0xff]  ;;  %v198_v10 = vld [vmem:[%s1909_s8 + $0x8] sm:$0xff]  ;;  %s1774_s7 = scalar_lea.hbm %s1773_s6, 64  ;;  %s1778_s11 = scalar_lea.hbm %s2763_s4, 128 }
  0x1e   : > { %279 = vmatpush.msra.mxu0 %v201_v4  ;;  %314 = vmatpush.msra.mxu1 %v202_v5  ;;  %p1775_p11 = scmp.ne.s32.totalorder %s1773_s6, %s1774_s7  ;;  %p1779_p0 = scmp.lt.s32.totalorder %s1773_s6, %s2763_s4 }
  0x1f   : > { %224 = vperm.xlu0 %1556, %v212_v6   ;;  %p1780_p1 = scmp.lt.s32.totalorder %s1778_s11, %s1774_s7 }
  0x20   : > { %280 = vmatpush.msra.mxu0 %v199_v7  ;;  %315 = vmatpush.msra.mxu1 %v200_v8  ;;  %p1776_p12 = pnand %p1775_p11, %p1891_p5 }
  0x21   : > { %p1781_p2 = por %p1780_p1, %p1779_p0 }
  0x22   : > { %281 = vmatpush.msra.mxu0 %v197_v9  ;;  %316 = vmatpush.msra.mxu1 %v198_v10  ;;  %p1777_p13 = pneg %p1776_p12 }
  0x23   : > { %1430 = vmatmul.msk.f32.vlgmr.msra.gmra.mxu0 %vm247_vm0, %v205_v11  ;;  %1436 = vmatmul.msk.f32.vlgmr.msra.gmra.mxu1 %vm247_vm0, %v205_v11 }
  0x24   : > { %p1782_p3 = pnand %p1781_p2, %p1777_p13 }
  0x2b   : > { %1431 = vmatmul.msk.f32.gmra.mxu0 %vm247_vm0, %v206_v12  ;;  %1437 = vmatmul.msk.f32.gmra.mxu1 %vm247_vm0, %v206_v12 }
  0x89   : > { %v220_v13 = vpop.permute.xlu0 %219 }
  0x91   : > { %v225_v18 = vpop.permute.xlu0 %224 }
  0xa0   : > { %v283_v14 = vpop.f32.mrf.mxu0  ;;  %v318_v15 = vpop.f32.mrf.mxu1 }
  0xa1   : > { %v319_v16 = vadd.f32 %v318_v15, %v220_v13  ;;  %v284_v17 = vadd.f32 %v283_v14, %v220_v13 }
  0xa3   : > { %336 = vxpose.xlu1.b32.start.end [1/1] (short) %v284_v17, 128 }
  0xa8   : > { %v286_v19 = vpop.f32.mrf.mxu0  ;;  %v321_v20 = vpop.f32.mrf.mxu1 }
  0xa9   : > { %v287_v21 = vadd.f32 %v286_v19, %v225_v18  ;;  %v322_v22 = vadd.f32 %v321_v20, %v225_v18 }
  0xab   : > { %512 = vmatpush.msra.mxu2 %v287_v21  ;;  %625 = vmatpush.msra.mxu3 %v322_v22 }
 0x123   : > { %368 = vxpose.xlu1.b32.start.end [1/1] (short) %v319_v16, 128 }
 0x147   : > { %v352_v23 = vpop.trf.xlu1 }
 0x148   : > { %1442 = vmatmul.msk.f32.vlgmr.msra.gmra.mxu2 %vm400_vm1, %v352_v23  ;;  %1474 = vmatmul.msk.f32.vlgmr.msra.gmra.mxu3 %vm400_vm1, %v352_v23 }
 0x14f   : > { %v353_v24 = vpop.trf.xlu1 }
 0x150   : > { %1443 = vmatmul.msk.f32.gmra.mxu2 %vm400_vm1, %v353_v24  ;;  %1475 = vmatmul.msk.f32.gmra.mxu3 %vm400_vm1, %v353_v24 }
 0x157   : > { %v354_v25 = vpop.trf.xlu1 }
 0x158   : > { %1444 = vmatmul.msk.f32.gmra.mxu2 %vm400_vm1, %v354_v25  ;;  %1476 = vmatmul.msk.f32.gmra.mxu3 %vm400_vm1, %v354_v25 }
 0x15f   : > { %v355_v26 = vpop.trf.xlu1 }
 0x160   : > { %1445 = vmatmul.msk.f32.gmra.mxu2 %vm400_vm1, %v355_v26  ;;  %1477 = vmatmul.msk.f32.gmra.mxu3 %vm400_vm1, %v355_v26 }
 0x167   : > { %v356_v27 = vpop.trf.xlu1 }
 0x168   : > { %1446 = vmatmul.msk.f32.gmra.mxu2 %vm400_vm1, %v356_v27  ;;  %1478 = vmatmul.msk.f32.gmra.mxu3 %vm400_vm1, %v356_v27 }
 0x16f   : > { %v357_v28 = vpop.trf.xlu1 }
 0x170   : > { %1447 = vmatmul.msk.f32.gmra.mxu2 %vm400_vm1, %v357_v28  ;;  %1479 = vmatmul.msk.f32.gmra.mxu3 %vm400_vm1, %v357_v28 }
 0x177   : > { %v358_v29 = vpop.trf.xlu1 }
 0x178   : > { %1448 = vmatmul.msk.f32.gmra.mxu2 %vm400_vm1, %v358_v29  ;;  %1480 = vmatmul.msk.f32.gmra.mxu3 %vm400_vm1, %v358_v29 }
 0x17f   : > { %v359_v30 = vpop.trf.xlu1 }
 0x180   : > { %1449 = vmatmul.msk.f32.gmra.mxu2 %vm400_vm1, %v359_v30  ;;  %1481 = vmatmul.msk.f32.gmra.mxu3 %vm400_vm1, %v359_v30 }
 0x187   : > { %v360_v31 = vpop.trf.xlu1 }
 0x188   : > { %1450 = vmatmul.msk.f32.gmra.mxu2 %vm400_vm1, %v360_v31  ;;  %1482 = vmatmul.msk.f32.gmra.mxu3 %vm400_vm1, %v360_v31 }
 0x18f   : > { %v361_v32 = vpop.trf.xlu1 }
 0x190   : > { %1451 = vmatmul.msk.f32.gmra.mxu2 %vm400_vm1, %v361_v32  ;;  %1483 = vmatmul.msk.f32.gmra.mxu3 %vm400_vm1, %v361_v32 }
 0x197   : > { %v362_v33 = vpop.trf.xlu1 }
 0x198   : > { %1452 = vmatmul.msk.f32.gmra.mxu2 %vm400_vm1, %v362_v33  ;;  %1484 = vmatmul.msk.f32.gmra.mxu3 %vm400_vm1, %v362_v33 }
 0x19f   : > { %v363_v34 = vpop.trf.xlu1 }
 0x1a0   : > { %1453 = vmatmul.msk.f32.gmra.mxu2 %vm400_vm1, %v363_v34  ;;  %1485 = vmatmul.msk.f32.gmra.mxu3 %vm400_vm1, %v363_v34 }
 0x1a7   : > { %v364_v35 = vpop.trf.xlu1 }
 0x1a8   : > { %1454 = vmatmul.msk.f32.gmra.mxu2 %vm400_vm1, %v364_v35  ;;  %1486 = vmatmul.msk.f32.gmra.mxu3 %vm400_vm1, %v364_v35 }
 0x1af   : > { %v365_v36 = vpop.trf.xlu1 }
 0x1b0   : > { %1455 = vmatmul.msk.f32.gmra.mxu2 %vm400_vm1, %v365_v36  ;;  %1487 = vmatmul.msk.f32.gmra.mxu3 %vm400_vm1, %v365_v36 }
 0x1b7   : > { %v366_v37 = vpop.trf.xlu1 }
 0x1b8   : > { %1456 = vmatmul.msk.f32.gmra.mxu2 %vm400_vm1, %v366_v37  ;;  %1488 = vmatmul.msk.f32.gmra.mxu3 %vm400_vm1, %v366_v37 }
 0x1bf   : > { %v367_v38 = vpop.trf.xlu1 }
 0x1c0   : > { %1457 = vmatmul.msk.f32.gmra.mxu2 %vm400_vm1, %v367_v38  ;;  %1489 = vmatmul.msk.f32.gmra.mxu3 %vm400_vm1, %v367_v38 }
 0x1c7   : > { %v384_v39 = vpop.trf.xlu1 }
 0x1c8   : > { %1458 = vmatmul.msk.f32.gmra.mxu2 %vm400_vm1, %v384_v39  ;;  %1490 = vmatmul.msk.f32.gmra.mxu3 %vm400_vm1, %v384_v39 }
 0x1cb   : > { %v1966_v40 = vpop.f32.mrf.mxu2  ;;  %v1968_v41 = vpop.f32.mrf.mxu3 }
 0x1cc   : > { %2805 = vst [vmem:[#allocation6_spill] sm:$0xff] %v1968_v41  ;;  %v723_v42 = vmax.f32 %v1966_v40, %v1968_v41 }
 0x1ce   : > { %724 = vmax.xlane.f32.xlu2 %v723_v42 }
 0x1cf   : > { %v385_v43 = vpop.trf.xlu1 }
 0x1d0   : > { %1459 = vmatmul.msk.f32.gmra.mxu2 %vm400_vm1, %v385_v43  ;;  %1491 = vmatmul.msk.f32.gmra.mxu3 %vm400_vm1, %v385_v43 }
 0x1d3   : > { %v1974_v44 = vpop.f32.mrf.mxu2  ;;  %v1976_v45 = vpop.f32.mrf.mxu3 }
 0x1d4   : > { %v726_v46 = vmax.f32 %v1974_v44, %v1976_v45 }
 0x1d6   : > { %727 = vmax.xlane.f32.xlu0 %v726_v46 }
 0x1d7   : > { %v386_v47 = vpop.trf.xlu1 }
 0x1d8   : > { %1460 = vmatmul.msk.f32.gmra.mxu2 %vm400_vm1, %v386_v47  ;;  %1492 = vmatmul.msk.f32.gmra.mxu3 %vm400_vm1, %v386_v47 }
 0x1db   : > { %v1982_v48 = vpop.f32.mrf.mxu2  ;;  %v1984_v49 = vpop.f32.mrf.mxu3 }
 0x1dc   : > { %v729_v50 = vmax.f32 %v1982_v48, %v1984_v49 }
 0x1de   : > { %730 = vmax.xlane.f32.xlu2 %v729_v50 }
 0x1df   : > { %v387_v51 = vpop.trf.xlu1 }
 0x1e0   : > { %1461 = vmatmul.msk.f32.gmra.mxu2 %vm400_vm1, %v387_v51  ;;  %1493 = vmatmul.msk.f32.gmra.mxu3 %vm400_vm1, %v387_v51 }
 0x1e3   : > { %v1990_v52 = vpop.f32.mrf.mxu2  ;;  %v1992_v53 = vpop.f32.mrf.mxu3 }
 0x1e4   : > { %v732_v54 = vmax.f32 %v1990_v52, %v1992_v53 }
 0x1e6   : > { %733 = vmax.xlane.f32.xlu2 %v732_v54 }
 0x1e7   : > { %v388_v55 = vpop.trf.xlu1 }
 0x1e8   : > { %1462 = vmatmul.msk.f32.gmra.mxu2 %vm400_vm1, %v388_v55  ;;  %1494 = vmatmul.msk.f32.gmra.mxu3 %vm400_vm1, %v388_v55 }
 0x1eb   : > { %v1998_v56 = vpop.f32.mrf.mxu2  ;;  %v2000_v57 = vpop.f32.mrf.mxu3 }
 0x1ec   : > { %v735_v58 = vmax.f32 %v1998_v56, %v2000_v57 }
 0x1ee   : > { %736 = vmax.xlane.f32.xlu2 %v735_v58 }
 0x1ef   : > { %v389_v59 = vpop.trf.xlu1 }
 0x1f0   : > { %1463 = vmatmul.msk.f32.gmra.mxu2 %vm400_vm1, %v389_v59  ;;  %1495 = vmatmul.msk.f32.gmra.mxu3 %vm400_vm1, %v389_v59 }
 0x1f3   : > { %v2006_v60 = vpop.f32.mrf.mxu2  ;;  %v2008_v61 = vpop.f32.mrf.mxu3 }
 0x1f4   : > { %v738_v62 = vmax.f32 %v2006_v60, %v2008_v61 }
 0x1f6   : > { %739 = vmax.xlane.f32.xlu2 %v738_v62 }
 0x1f7   : > { %v390_v63 = vpop.trf.xlu1 }
 0x1f8   : > { %1464 = vmatmul.msk.f32.gmra.mxu2 %vm400_vm1, %v390_v63  ;;  %1496 = vmatmul.msk.f32.gmra.mxu3 %vm400_vm1, %v390_v63 }
 0x1fb   : > { %v2014_v0 = vpop.f32.mrf.mxu2  ;;  %v2016_v1 = vpop.f32.mrf.mxu3 }
 0x1fc   : > { %v741_v2 = vmax.f32 %v2014_v0, %v2016_v1 }
 0x1fe   : > { %742 = vmax.xlane.f32.xlu2 %v741_v2 }
 0x1ff   : > { %v391_v3 = vpop.trf.xlu1 }
 0x200   : > { %1465 = vmatmul.msk.f32.gmra.mxu2 %vm400_vm1, %v391_v3  ;;  %1497 = vmatmul.msk.f32.gmra.mxu3 %vm400_vm1, %v391_v3 }
 0x203   : > { %v2022_v4 = vpop.f32.mrf.mxu2  ;;  %v2024_v5 = vpop.f32.mrf.mxu3 }
 0x204   : > { %v744_v6 = vmax.f32 %v2022_v4, %v2024_v5 }
 0x206   : > { %745 = vmax.xlane.f32.xlu2 %v744_v6 }
 0x207   : > { %v392_v7 = vpop.trf.xlu1 }
 0x208   : > { %1466 = vmatmul.msk.f32.gmra.mxu2 %vm400_vm1, %v392_v7  ;;  %1498 = vmatmul.msk.f32.gmra.mxu3 %vm400_vm1, %v392_v7 }
 0x20b   : > { %v2030_v8 = vpop.f32.mrf.mxu2  ;;  %v2032_v9 = vpop.f32.mrf.mxu3 }
 0x20c   : > { %v747_v10 = vmax.f32 %v2030_v8, %v2032_v9 }
 0x20e   : > { %748 = vmax.xlane.f32.xlu2 %v747_v10 }
 0x20f   : > { %v393_v11 = vpop.trf.xlu1 }
 0x210   : > { %1467 = vmatmul.msk.f32.gmra.mxu2 %vm400_vm1, %v393_v11  ;;  %1499 = vmatmul.msk.f32.gmra.mxu3 %vm400_vm1, %v393_v11 }
 0x213   : > { %v2038_v12 = vpop.f32.mrf.mxu2  ;;  %v2040_v13 = vpop.f32.mrf.mxu3 }
 0x214   : > { %v750_v14 = vmax.f32 %v2038_v12, %v2040_v13 }
 0x216   : > { %751 = vmax.xlane.f32.xlu2 %v750_v14 }
 0x217   : > { %v394_v15 = vpop.trf.xlu1 }
 0x218   : > { %1468 = vmatmul.msk.f32.gmra.mxu2 %vm400_vm1, %v394_v15  ;;  %1500 = vmatmul.msk.f32.gmra.mxu3 %vm400_vm1, %v394_v15 }
 0x21b   : > { %v2046_v16 = vpop.f32.mrf.mxu2  ;;  %v2048_v17 = vpop.f32.mrf.mxu3 }
 0x21c   : > { %v753_v18 = vmax.f32 %v2046_v16, %v2048_v17 }
 0x21e   : > { %754 = vmax.xlane.f32.xlu2 %v753_v18 }
 0x21f   : > { %v395_v19 = vpop.trf.xlu1 }
 0x220   : > { %1469 = vmatmul.msk.f32.gmra.mxu2 %vm400_vm1, %v395_v19  ;;  %1501 = vmatmul.msk.f32.gmra.mxu3 %vm400_vm1, %v395_v19 }
 0x223   : > { %v2054_v20 = vpop.f32.mrf.mxu2  ;;  %v2056_v21 = vpop.f32.mrf.mxu3 }
 0x224   : > { %v756_v22 = vmax.f32 %v2054_v20, %v2056_v21 }
 0x226   : > { %757 = vmax.xlane.f32.xlu2 %v756_v22 }
 0x227   : > { %v396_v23 = vpop.trf.xlu1 }
 0x228   : > { %1470 = vmatmul.msk.f32.gmra.mxu2 %vm400_vm1, %v396_v23  ;;  %1502 = vmatmul.msk.f32.gmra.mxu3 %vm400_vm1, %v396_v23 }
 0x22b   : > { %v2062_v24 = vpop.f32.mrf.mxu2  ;;  %v2064_v25 = vpop.f32.mrf.mxu3 }
 0x22c   : > { %v759_v26 = vmax.f32 %v2062_v24, %v2064_v25 }
 0x22e   : > { %760 = vmax.xlane.f32.xlu2 %v759_v26 }
 0x233   : > { %v2068_v27 = vpop.f32.mrf.mxu2  ;;  %v2070_v28 = vpop.f32.mrf.mxu3 }
 0x234   : > { %v762_v29 = vmax.f32 %v2068_v27, %v2070_v28 }
 0x236   : > { %763 = vmax.xlane.f32.xlu0 %v762_v29 }
 0x23b   : > { %v2074_v30 = vpop.f32.mrf.mxu2  ;;  %v2076_v31 = vpop.f32.mrf.mxu3 }
 0x23c   : > { %2806 = vst [vmem:[#allocation7_spill] sm:$0xff] %v2074_v30  ;;  %v765_v32 = vmax.f32 %v2074_v30, %v2076_v31 }
 0x23d   : > { %2807 = vst [vmem:[#allocation8_spill] sm:$0xff] %v2076_v31 }
 0x23e   : > { %766 = vmax.xlane.f32.xlu2 %v765_v32 }
 0x241   : > { %v2086_v36 = vpop.xlane.xlu2 %724 }
 0x243   : > { %v2080_v33 = vpop.f32.mrf.mxu2  ;;  %v2082_v34 = vpop.f32.mrf.mxu3 }
 0x244   : > { %v768_v35 = vmax.f32 %v2080_v33, %v2082_v34 }
 0x246   : > { %769 = vmax.xlane.f32.xlu2 %v768_v35 }
 0x24b   : > { %v2088_v37 = vpop.f32.mrf.mxu2  ;;  %v2090_v38 = vpop.f32.mrf.mxu3 }
 0x251   : > { %v2092_v39 = vpop.xlane.xlu2 %730 }
 0x253   : > { %v2094_v42 = vpop.f32.mrf.mxu2  ;;  %v2096_v43 = vpop.f32.mrf.mxu3 }
 0x254   : > { %2808 = vst [vmem:[#allocation9_spill] sm:$0xff] %v2094_v42 }
 0x255   : > { %2809 = vst [vmem:[#allocation10_spill] sm:$0xff] %v2096_v43 }
 0x259   : > { %v2098_v46 = vpop.xlane.xlu2 %733 }
 0x25b   : > { %v2100_v47 = vpop.f32.mrf.mxu2  ;;  %v2102_v50 = vpop.f32.mrf.mxu3 }
 0x261   : > { %v2104_v51 = vpop.xlane.xlu2 %736 }
 0x263   : > { %v2106_v54 = vpop.f32.mrf.mxu2  ;;  %v2108_v55 = vpop.f32.mrf.mxu3 }
 0x269   : > { %v2110_v58 = vpop.xlane.xlu2 %739 }
 0x26b   : > { %v2112_v59 = vpop.f32.mrf.mxu2  ;;  %v2114_v62 = vpop.f32.mrf.mxu3 }
 0x271   : > { %v2116_v63 = vpop.xlane.xlu2 %742 }
 0x273   : > { %v2118_v2 = vpop.f32.mrf.mxu2  ;;  %v2120_v3 = vpop.f32.mrf.mxu3 }
 0x279   : > { %v2122_v6 = vpop.xlane.xlu2 %745 }
 0x27b   : > { %v2124_v7 = vpop.f32.mrf.mxu2  ;;  %v2126_v10 = vpop.f32.mrf.mxu3 }
 0x27c   : > { %2810 = vst [vmem:[#allocation11_spill] sm:$0xff] %v2124_v7  ;;  %v789_v30 = vmax.f32 %v2124_v7, %v2126_v10 }
 0x27d   : > { %2811 = vst [vmem:[#allocation12_spill] sm:$0xff] %v2126_v10 }
 0x281   : > { %v2128_v11 = vpop.xlane.xlu2 %748 }
 0x283   : > { %v2130_v14 = vpop.f32.mrf.mxu2  ;;  %v2132_v15 = vpop.f32.mrf.mxu3 }
 0x284   : > { %2812 = vst [vmem:[#allocation13_spill] sm:$0xff] %v2130_v14  ;;  %v792_v18 = vmax.f32 %v2130_v14, %v2132_v15 }
 0x285   : > { %2813 = vst [vmem:[#allocation14_spill] sm:$0xff] %v2132_v15 }
 0x286   : > { %793 = vmax.xlane.f32.xlu0 %v792_v18 }
 0x289   : > { %v2136_v19 = vpop.xlane.xlu2 %751 }
 0x28b   : > { %v2138_v22 = vpop.f32.mrf.mxu2  ;;  %v2140_v23 = vpop.f32.mrf.mxu3 }
 0x28c   : > { %2814 = vst [vmem:[#allocation15_spill] sm:$0xff] %v2138_v22  ;;  %v795_v26 = vmax.f32 %v2138_v22, %v2140_v23 }
 0x28d   : > { %2815 = vst [vmem:[#allocation16_spill] sm:$0xff] %v2140_v23  ;;  %v397_v23 = vpop.trf.xlu1 }
 0x28e   : > { %796 = vmax.xlane.f32.xlu0 %v795_v26  ;;  %1471 = vmatmul.msk.f32.gmra.mxu2 %vm400_vm1, %v397_v23 }
 0x28f   : > { %1503 = vmatmul.msk.f32.gmra.mxu3 %vm400_vm1, %v397_v23 }
 0x291   : > { %v755_v29 = vpop.xlane.xlu2 %754 }
 0x293   : > { %v2144_v32 = vpop.f32.mrf.mxu2  ;;  %v2146_v35 = vpop.f32.mrf.mxu3 }
 0x294   : > { %2816 = vst [vmem:[#allocation17_spill] sm:$0xff] %v2144_v32  ;;  %v798_v31 = vmax.f32 %v2144_v32, %v2146_v35 }
 0x295   : > { %2817 = vst [vmem:[#allocation18_spill] sm:$0xff] %v2146_v35 }
 0x296   : > { %799 = vmax.xlane.f32.xlu2 %v798_v31 }
 0x299   : > { %v758_v18 = vpop.xlane.xlu2 %757 }
 0x29a   : > { %v841_v31 = vsub.f32 %v2054_v20, %v758_v18  ;;  %v842_v41 = vsub.f32 %v2056_v21, %v758_v18  ;;  %v839_v21 = vsub.f32 %v2046_v16, %v755_v29 }
 0x29b   : > { %v2150_v15 = vpop.f32.mrf.mxu2  ;;  %v2152_v14 = vpop.f32.mrf.mxu3 }
 0x29c   : > { %2818 = vst [vmem:[#allocation19_spill] sm:$0xff] %v2150_v15  ;;  %v801_v26 = vmax.f32 %v2150_v15, %v2152_v14  ;;  %v927_v15 = vmul.f32 1.442695, %v841_v31  ;;  %v929_v20 = vmul.f32 1.442695, %v842_v41  ;;  %v783_v41 = vmax.f32 %v2112_v59, %v2114_v62 }
 0x29d   : > { %2819 = vst [vmem:[#allocation20_spill] sm:$0xff] %v2152_v14  ;;  %v786_v14 = vmax.f32 %v2118_v2, %v2120_v3  ;;  %v923_v31 = vmul.f32 1.442695, %v839_v21  ;;  %v780_v21 = vmax.f32 %v2106_v54, %v2108_v55 }
 0x29e   : > { %790 = vmax.xlane.f32.xlu2 %v789_v30  ;;  %802 = vmax.xlane.f32.xlu0 %v801_v26 }
 0x2a1   : > { %v761_v35 = vpop.xlane.xlu2 %760 }
 0x2a2   : > { %v843_v32 = vsub.f32 %v2062_v24, %v761_v35  ;;  %v844_v22 = vsub.f32 %v2064_v25, %v761_v35  ;;  %v398_v24 = vpop.trf.xlu1  ;;  %v840_v25 = vsub.f32 %v2048_v17, %v755_v29  ;;  %v831_v29 = vsub.f32 %v2014_v0, %v2116_v63 }
 0x2a3   : > { %v2164_v10 = vpop.f32.mrf.mxu2  ;;  %v2166_v7 = vpop.f32.mrf.mxu3  ;;  %1472 = vmatmul.msk.f32.gmra.mxu2 %vm400_vm1, %v398_v24  ;;  %1504 = vmatmul.msk.f32.gmra.mxu3 %vm400_vm1, %v398_v24 }
 0x2a4   : > { %v931_v30 = vmul.f32 1.442695, %v843_v32  ;;  %v933_v26 = vmul.f32 1.442695, %v844_v22  ;;  %v804_v23 = vmax.f32 %v2164_v10, %v2166_v7  ;;  %v925_v17 = vmul.f32 1.442695, %v840_v25 }
 0x2a5   : > { %v907_v24 = vmul.f32 1.442695, %v831_v29 }
 0x2a6   : > { %1558 = vpow2.f32 %v931_v30  ;;  %787 = vmax.xlane.f32.xlu2 %v786_v14  ;;  %805 = vmax.xlane.f32.xlu0 %v804_v23  ;;  %v837_v23 = vsub.f32 %v2038_v12, %v2136_v19 }
 0x2a7   : > { %1560 = vpow2.f32 %v933_v26  ;;  %v832_v26 = vsub.f32 %v2016_v1, %v2116_v63  ;;  %v2206_v63 = vpop.xlane.xlu0 %727 }
 0x2a8   : > { %1562 = vpow2.f32 %v927_v15 }
 0x2a9   : > { %1564 = vpow2.f32 %v929_v20  ;;  %v838_v20 = vsub.f32 %v2040_v13, %v2136_v19  ;;  %v909_v25 = vmul.f32 1.442695, %v832_v26 }
 0x2aa   : > { %1566 = vpow2.f32 %v923_v31  ;;  %v399_v1 = vpop.trf.xlu1  ;;  %v836_v31 = vsub.f32 %v2032_v9, %v2128_v11  ;;  %v833_v9 = vsub.f32 %v2022_v4, %v2122_v6 }
 0x2ab   : > { %v2176_v22 = vpop.f32.mrf.mxu2  ;;  %v2178_v32 = vpop.f32.mrf.mxu3  ;;  %1568 = vpow2.f32 %v925_v17  ;;  %v921_v12 = vmul.f32 1.442695, %v838_v20  ;;  %1473 = vmatmul.msk.f32.gmra.mxu2 %vm400_vm1, %v399_v1  ;;  %1505 = vmatmul.msk.f32.gmra.mxu3 %vm400_vm1, %v399_v1 }
 0x2ac   : > { %v2180_v35 = vpop.eup %1558  ;;  %v807_v14 = vmax.f32 %v2176_v22, %v2178_v32  ;;  %1570 = vpow2.f32 %v907_v24  ;;  %v911_v1 = vmul.f32 1.442695, %v833_v9 }
 0x2ad   : > { %v2186_v18 = vpop.eup %1560  ;;  %1572 = vpow2.f32 %v909_v25 }
 0x2ae   : > { %784 = vmax.xlane.f32.xlu2 %v783_v41  ;;  %808 = vmax.xlane.f32.xlu0 %v807_v14  ;;  %v1047_v16 = vadd.f32 %v2186_v18, %v2180_v35  ;;  %v2190_v15 = vpop.eup %1562  ;;  %v919_v41 = vmul.f32 1.442695, %v837_v23  ;;  %v835_v14 = vsub.f32 %v2030_v8, %v2128_v11  ;;  %v917_v8 = vmul.f32 1.442695, %v836_v31 }
 0x2af   : > { %v2194_v30 = vpop.eup %1564  ;;  %v764_v24 = vpop.xlane.xlu0 %763 }
 0x2b0   : > { %1048 = vadd.xlane.f32.xlu1 %v1047_v16  ;;  %v1044_v0 = vadd.f32 %v2194_v30, %v2190_v15  ;;  %v2210_v13 = vpop.eup %1566  ;;  %1574 = vpow2.f32 %v919_v41  ;;  %v777_v16 = vmax.f32 %v2100_v47, %v2102_v50  ;;  %v915_v23 = vmul.f32 1.442695, %v835_v14 }
 0x2b1   : > { %v2212_v19 = vpop.eup %1568  ;;  %1576 = vpow2.f32 %v921_v12  ;;  %v2222_v29 = vpop.xlane.xlu2 %766  ;;  %v845_v25 = vsub.f32 %v2068_v27, %v764_v24  ;;  %v846_v41 = vsub.f32 %v2070_v28, %v764_v24 }
 0x2b2   : > { %v1041_v17 = vadd.f32 %v2212_v19, %v2210_v13  ;;  %v2224_v26 = vpop.eup %1570  ;;  %1578 = vpow2.f32 %v915_v23  ;;  %v771_v23 = vmax.f32 %v2088_v37, %v2090_v38 }
 0x2b3   : > { %v2226_v20 = vpop.eup %1572  ;;  %1580 = vpow2.f32 %v917_v8  ;;  %v935_v4 = vmul.f32 1.442695, %v845_v25 }
 0x2b4   : > { %v1029_v12 = vadd.f32 %v2226_v20, %v2224_v26  ;;  %1582 = vpow2.f32 %v911_v1  ;;  %v830_v1 = vsub.f32 %v2008_v61, %v2110_v58  ;;  %v828_v61 = vsub.f32 %v2000_v57, %v2104_v51 }
 0x2b5   : > { %v826_v57 = vsub.f32 %v1992_v53, %v2098_v46 }
 0x2b6   : > { %781 = vmax.xlane.f32.xlu2 %v780_v21  ;;  %1045 = vadd.xlane.f32.xlu0 %v1044_v0  ;;  %v2228_v21 = vpop.eup %1574  ;;  %v834_v0 = vsub.f32 %v2024_v5, %v2122_v6 }
 0x2b7   : > { %v2232_v11 = vpop.eup %1576 }
 0x2b8   : > { %v1038_v14 = vadd.f32 %v2232_v11, %v2228_v21  ;;  %v913_v31 = vmul.f32 1.442695, %v834_v0  ;;  %v2242_v5 = vpop.eup %1578 }
 0x2b9   : > { %v2244_v27 = vpop.eup %1580 }
 0x2ba   : > { %1584 = vpow2.f32 %v913_v31  ;;  %v1035_v8 = vadd.f32 %v2244_v27, %v2242_v5  ;;  %v2252_v24 = vpop.eup %1582 }
 0x2bb   : > { %1586 = vpow2.f32 %v935_v4  ;;  %v905_v4 = vmul.f32 1.442695, %v830_v1 }
 0x2be   : > { %778 = vmax.xlane.f32.xlu2 %v777_v16  ;;  %1042 = vadd.xlane.f32.xlu0 %v1041_v17  ;;  %v937_v16 = vmul.f32 1.442695, %v846_v41  ;;  %v770_v17 = vpop.xlane.xlu2 %769 }
 0x2bf   : > { %v849_v28 = vsub.f32 %v2080_v33, %v770_v17  ;;  %v850_v6 = vsub.f32 %v2082_v34, %v770_v17  ;;  %v829_v34 = vsub.f32 %v2006_v60, %v2110_v58  ;;  %v827_v60 = vsub.f32 %v1998_v56, %v2104_v51 }
 0x2c0   : > { %1588 = vpow2.f32 %v937_v16  ;;  %v2254_v0 = vpop.eup %1584  ;;  %v825_v56 = vsub.f32 %v1990_v52, %v2098_v46  ;;  %v824_v52 = vsub.f32 %v1984_v49, %v2092_v39 }
 0x2c1   : > { %v943_v9 = vmul.f32 1.442695, %v849_v28  ;;  %v945_v25 = vmul.f32 1.442695, %v850_v6  ;;  %v2256_v41 = vpop.eup %1586  ;;  %v903_v31 = vmul.f32 1.442695, %v829_v34  ;;  %v774_v28 = vmax.f32 %v2094_v42, %v2096_v43 }
 0x2c2   : > { %v899_v6 = vmul.f32 1.442695, %v827_v60  ;;  %v897_v34 = vmul.f32 1.442695, %v826_v57  ;;  %v2826_v42 = vld [vmem:[#allocation11_spill] sm:$0xff] }
 0x2c3   : > { %1590 = vpow2.f32 %v943_v9 }
 0x2c4   : > { %1592 = vpow2.f32 %v945_v25  ;;  %v895_v25 = vmul.f32 1.442695, %v825_v56 }
 0x2c5   : > { %1594 = vpow2.f32 %v903_v31  ;;  %v893_v31 = vmul.f32 1.442695, %v824_v52 }
 0x2c6   : > { %1030 = vadd.xlane.f32.xlu2 %v1029_v12  ;;  %1039 = vadd.xlane.f32.xlu0 %v1038_v14  ;;  %v2258_v33 = vpop.eup %1588  ;;  %v1032_v14 = vadd.f32 %v2254_v0, %v2252_v24  ;;  %1596 = vpow2.f32 %v905_v4 }
 0x2c7   : > { %v1050_v12 = vadd.f32 %v2258_v33, %v2256_v41  ;;  %1598 = vpow2.f32 %v899_v6 }
 0x2c9   : > { %v2268_v16 = vpop.eup %1590 }
 0x2ca   : > { %v2270_v17 = vpop.eup %1592 }
 0x2cb   : > { %v1056_v58 = vadd.f32 %v2270_v17, %v2268_v16 }
 0x2ce   : > { %772 = vmax.xlane.f32.xlu2 %v771_v23  ;;  %1036 = vadd.xlane.f32.xlu0 %v1035_v8  ;;  %v901_v23 = vmul.f32 1.442695, %v828_v61  ;;  %v2280_v8 = vpop.eup %1594  ;;  %v821_v61 = vsub.f32 %v1974_v44, %v2206_v63  ;;  %v819_v44 = vsub.f32 %v1966_v40, %v2086_v36 }
 0x2cf   : > { %v2282_v9 = vpop.eup %1596 }
 0x2d0   : > { %1600 = vpow2.f32 %v901_v23  ;;  %v1026_v51 = vadd.f32 %v2282_v9, %v2280_v8  ;;  %v2290_v1 = vpop.eup %1598  ;;  %v207_v23 = vld [vmem:[%s2760_s1 + $0x10] sm:$0xff]  ;;  %v883_v57 = vmul.f32 1.442695, %v819_v44 }
 0x2d1   : > { %1602 = vpow2.f32 %v895_v25  ;;  %1432 = vmatmul.msk.f32.gmra.mxu0 %vm247_vm0, %v207_v23  ;;  %1438 = vmatmul.msk.f32.gmra.mxu1 %vm247_vm0, %v207_v23 }
 0x2d2   : > { %1604 = vpow2.f32 %v897_v34 }
 0x2d6   : > { %1051 = vadd.xlane.f32.xlu2 %v1050_v12  ;;  %1033 = vadd.xlane.f32.xlu0 %v1032_v14  ;;  %v2292_v12 = vpop.eup %1600  ;;  %v823_v14 = vsub.f32 %v1982_v48, %v2092_v39  ;;  %v822_v48 = vsub.f32 %v1976_v45, %v2206_v63  ;;  %v887_v39 = vmul.f32 1.442695, %v821_v61  ;;  %v2820_v45 = vld [vmem:[#allocation6_spill] sm:$0xff] }
 0x2d7   : > { %v1023_v53 = vadd.f32 %v2292_v12, %v2290_v1  ;;  %v2300_v4 = vpop.eup %1602  ;;  %v820_v63 = vsub.f32 %v2820_v45, %v2086_v36 }
 0x2d8   : > { %v891_v46 = vmul.f32 1.442695, %v823_v14  ;;  %v2302_v60 = vpop.eup %1604 }
 0x2d9   : > { %v1020_v49 = vadd.f32 %v2302_v60, %v2300_v4 }
 0x2da   : > { %1606 = vpow2.f32 %v891_v46 }
 0x2db   : > { %1608 = vpow2.f32 %v893_v31 }
 0x2dc   : > { %1610 = vpow2.f32 %v887_v39 }
 0x2de   : > { %1057 = vadd.xlane.f32.xlu2 %v1056_v58  ;;  %775 = vmax.xlane.f32.xlu0 %v774_v28  ;;  %v889_v58 = vmul.f32 1.442695, %v822_v48 }
 0x2e0   : > { %v2310_v28 = vpop.eup %1606  ;;  %1612 = vpow2.f32 %v889_v58 }
 0x2e1   : > { %v2312_v6 = vpop.eup %1608  ;;  %1614 = vpow2.f32 %v883_v57 }
 0x2e2   : > { %v1017_v56 = vadd.f32 %v2312_v6, %v2310_v28  ;;  %v2325_v25 = vpop.eup %1610 }
 0x2e3   : > { %2821 = vst [vmem:[#allocation6_spill] sm:$0xff] %v2325_v25 }
 0x2e6   : > { %1027 = vadd.xlane.f32.xlu0 %v1026_v51  ;;  %v885_v51 = vmul.f32 1.442695, %v820_v63  ;;  %v2327_v34 = vpop.eup %1612 }
 0x2e7   : > { %2822 = vst [vmem:[#allocation21_spill] sm:$0xff] %v2327_v34  ;;  %v1014_v40 = vadd.f32 %v2327_v34, %v2325_v25  ;;  %v2331_v14 = vpop.eup %1614 }
 0x2e8   : > { %1616 = vpow2.f32 %v885_v51  ;;  %2823 = vst [vmem:[#allocation22_spill] sm:$0xff] %v2331_v14 }
 0x2ee   : > { %1024 = vadd.xlane.f32.xlu0 %v1023_v53  ;;  %v2333_v36 = vpop.eup %1616 }
 0x2ef   : > { %2824 = vst [vmem:[#allocation23_spill] sm:$0xff] %v2333_v36  ;;  %v1011_v53 = vadd.f32 %v2333_v36, %v2331_v14  ;;  %v2842_v14 = vld [vmem:[#allocation8_spill] sm:$0xff] }
 0x2f0   : > { %v848_v34 = vsub.f32 %v2842_v14, %v2222_v29 }
 0x2f6   : > { %1021 = vadd.xlane.f32.xlu0 %v1020_v49  ;;  %v213_v49 = vld [vmem:[%s2761_s2 + $0x10] sm:$0xff] }
 0x2f9   : > { %v2337_v46 = vpop.xlane.xlu0 %793 }
 0x2fe   : > { %1018 = vadd.xlane.f32.xlu0 %v1017_v56 }
 0x301   : > { %v797_v48 = vpop.xlane.xlu0 %796 }
 0x306   : > { %1015 = vadd.xlane.f32.xlu0 %v1014_v40 }
 0x309   : > { %v800_v52 = vpop.xlane.xlu2 %799 }
 0x30e   : > { %1012 = vadd.xlane.f32.xlu0 %v1011_v53 }
 0x311   : > { %v791_v31 = vpop.xlane.xlu2 %790  ;;  %v803_v44 = vpop.xlane.xlu0 %802 }
 0x319   : > { %v788_v61 = vpop.xlane.xlu2 %787 }
 0x31a   : > { %v861_v45 = vsub.f32 %v2118_v2, %v788_v61  ;;  %v862_v57 = vsub.f32 %v2120_v3, %v788_v61  ;;  %v2354_v2 = vpop.xlane.xlu0 %805 }
 0x31c   : > { %v967_v51 = vmul.f32 1.442695, %v861_v45  ;;  %v969_v40 = vmul.f32 1.442695, %v862_v57  ;;  %v2832_v57 = vld [vmem:[#allocation16_spill] sm:$0xff] }
 0x321   : > { %v785_v39 = vpop.xlane.xlu2 %784 }
 0x322   : > { %v859_v58 = vsub.f32 %v2112_v59, %v785_v39  ;;  %v860_v23 = vsub.f32 %v2114_v62, %v785_v39  ;;  %229 = vperm.xlu0 %1556, %v213_v49   ;;  %v863_v59 = vsub.f32 %v2826_v42, %v791_v31  ;;  %v2828_v49 = vld [vmem:[#allocation12_spill] sm:$0xff]  ;;  %v2831_v42 = vld [vmem:[#allocation15_spill] sm:$0xff] }
 0x323   : > { %v864_v39 = vsub.f32 %v2828_v49, %v791_v31  ;;  %v868_v31 = vsub.f32 %v2832_v57, %v797_v48 }
 0x324   : > { %v963_v63 = vmul.f32 1.442695, %v859_v58  ;;  %v965_v56 = vmul.f32 1.442695, %v860_v23  ;;  %v971_v61 = vmul.f32 1.442695, %v863_v59 }
 0x325   : > { %v973_v58 = vmul.f32 1.442695, %v864_v39  ;;  %v981_v49 = vmul.f32 1.442695, %v868_v31 }
 0x326   : > { %1618 = vpow2.f32 %v963_v63 }
 0x327   : > { %1620 = vpow2.f32 %v965_v56  ;;  %v867_v56 = vsub.f32 %v2831_v42, %v797_v48  ;;  %v2835_v42 = vld [vmem:[#allocation17_spill] sm:$0xff]  ;;  %v2836_v48 = vld [vmem:[#allocation18_spill] sm:$0xff] }
 0x328   : > { %1622 = vpow2.f32 %v967_v51 }
 0x329   : > { %v2346_v53 = vpop.xlane.xlu2 %781  ;;  %1624 = vpow2.f32 %v969_v40  ;;  %v2368_v40 = vpop.xlane.xlu0 %808  ;;  %v979_v59 = vmul.f32 1.442695, %v867_v56 }
 0x32a   : > { %1626 = vpow2.f32 %v971_v61  ;;  %v869_v61 = vsub.f32 %v2835_v42, %v800_v52  ;;  %v2390_v42 = vpop.f32.mrf.mxu3 }
 0x32b   : > { %1628 = vpow2.f32 %v973_v58  ;;  %v870_v58 = vsub.f32 %v2836_v48, %v800_v52  ;;  %v2839_v52 = vld [vmem:[#allocation19_spill] sm:$0xff]  ;;  %v2840_v48 = vld [vmem:[#allocation20_spill] sm:$0xff] }
 0x32c   : > { %v2348_v43 = vpop.eup %1618  ;;  %1630 = vpow2.f32 %v979_v59  ;;  %v2388_v59 = vpop.f32.mrf.mxu2 }
 0x32d   : > { %2825 = vst [vmem:[#allocation24_spill] sm:$0xff] %v2348_v43  ;;  %v2351_v62 = vpop.eup %1620  ;;  %1632 = vpow2.f32 %v981_v49  ;;  %v985_v56 = vmul.f32 1.442695, %v870_v58  ;;  %v871_v49 = vsub.f32 %v2839_v52, %v803_v44  ;;  %v810_v36 = vmax.f32 %v2388_v59, %v2390_v42 }
 0x32e   : > { %2827 = vst [vmem:[#allocation11_spill] sm:$0xff] %v2351_v62  ;;  %v1071_v3 = vadd.f32 %v2351_v62, %v2348_v43  ;;  %v2360_v45 = vpop.eup %1622  ;;  %v983_v43 = vmul.f32 1.442695, %v869_v61  ;;  %v872_v61 = vsub.f32 %v2840_v48, %v803_v44 }
 0x32f   : > { %2829 = vst [vmem:[#allocation12_spill] sm:$0xff] %v2360_v45  ;;  %v2362_v63 = vpop.eup %1624 }
 0x330   : > { %1072 = vadd.xlane.f32.xlu2 %v1071_v3  ;;  %2830 = vst [vmem:[#allocation25_spill] sm:$0xff] %v2362_v63  ;;  %v1074_v51 = vadd.f32 %v2362_v63, %v2360_v45  ;;  %v2372_v3 = vpop.eup %1626  ;;  %1634 = vpow2.f32 %v983_v43  ;;  %v989_v43 = vmul.f32 1.442695, %v872_v61 }
 0x331   : > { %v2358_v23 = vpop.xlane.xlu2 %778  ;;  %2833 = vst [vmem:[#allocation15_spill] sm:$0xff] %v2372_v3  ;;  %v2374_v62 = vpop.eup %1628  ;;  %1636 = vpow2.f32 %v985_v56 }
 0x332   : > { %2834 = vst [vmem:[#allocation16_spill] sm:$0xff] %v2374_v62  ;;  %v1077_v57 = vadd.f32 %v2374_v62, %v2372_v3  ;;  %v2384_v63 = vpop.eup %1630  ;;  %v987_v3 = vmul.f32 1.442695, %v871_v49  ;;  %v873_v49 = vsub.f32 %v2164_v10, %v2354_v2  ;;  %v2416_v61 = vpop.f32.mrf.mxu3 }
 0x333   : > { %2837 = vst [vmem:[#allocation17_spill] sm:$0xff] %v2384_v63  ;;  %v2386_v45 = vpop.eup %1632 }
 0x334   : > { %2838 = vst [vmem:[#allocation18_spill] sm:$0xff] %v2386_v45  ;;  %v1083_v58 = vadd.f32 %v2386_v45, %v2384_v63  ;;  %1638 = vpow2.f32 %v987_v3  ;;  %v2414_v14 = vpop.f32.mrf.mxu2  ;;  %v991_v45 = vmul.f32 1.442695, %v873_v49  ;;  %v876_v3 = vsub.f32 %v2178_v32, %v2368_v40 }
 0x335   : > { %1640 = vpow2.f32 %v989_v43 }
 0x336   : > { %v2404_v56 = vpop.eup %1634 }
 0x337   : > { %2843 = vst [vmem:[#allocation19_spill] sm:$0xff] %v2404_v56  ;;  %v2406_v44 = vpop.eup %1636 }
 0x338   : > { %1075 = vadd.xlane.f32.xlu2 %v1074_v51  ;;  %v2380_v51 = vpop.xlane.xlu0 %1045  ;;  %2844 = vst [vmem:[#allocation20_spill] sm:$0xff] %v2406_v44 }
 0x339   : > { %v2370_v39 = vpop.xlane.xlu2 %1030 }
 0x340   : > { %1078 = vadd.xlane.f32.xlu2 %v1077_v57  ;;  %v2841_v57 = vld [vmem:[#allocation7_spill] sm:$0xff]  ;;  %v2408_v52 = vpop.xlane.xlu0 %1042 }
 0x341   : > { %v2382_v31 = vpop.xlane.xlu2 %772  ;;  %v847_v62 = vsub.f32 %v2841_v57, %v2222_v29  ;;  %v874_v29 = vsub.f32 %v2166_v7, %v2354_v2  ;;  %v1086_v57 = vadd.f32 %v2406_v44, %v2404_v56  ;;  %v875_v2 = vsub.f32 %v2176_v22, %v2368_v40  ;;  %v2848_v22 = vld [vmem:[#allocation14_spill] sm:$0xff] }
 0x343   : > { %v939_v48 = vmul.f32 1.442695, %v847_v62  ;;  %v813_v62 = vmax.f32 %v2414_v14, %v2416_v61  ;;  %v993_v10 = vmul.f32 1.442695, %v874_v29 }
 0x345   : > { %1642 = vpow2.f32 %v939_v48 }
 0x348   : > { %1084 = vadd.xlane.f32.xlu2 %v1083_v58  ;;  %v941_v58 = vmul.f32 1.442695, %v848_v34  ;;  %v2430_v43 = vpop.xlane.xlu0 %1039 }
 0x349   : > { %v2402_v25 = vpop.xlane.xlu2 %1051 }
 0x34a   : > { %1644 = vpow2.f32 %v941_v58 }
 0x34c   : > { %811 = vmax.xlane.f32.xlu0 %v810_v36  ;;  %v2422_v36 = vpop.eup %1638 }
 0x34d   : > { %2845 = vst [vmem:[#allocation7_spill] sm:$0xff] %v2422_v36  ;;  %v2424_v7 = vpop.eup %1640 }
 0x34e   : > { %2846 = vst [vmem:[#allocation8_spill] sm:$0xff] %v2424_v7  ;;  %v2432_v48 = vpop.eup %1642  ;;  %v1089_v49 = vadd.f32 %v2424_v7, %v2422_v36 }
 0x350   : > { %1087 = vadd.xlane.f32.xlu2 %v1086_v57  ;;  %v2436_v58 = vpop.eup %1644 }
 0x351   : > { %v1058_v34 = vpop.xlane.xlu2 %1057  ;;  %v1053_v44 = vadd.f32 %v2436_v58, %v2432_v48 }
 0x352   : > { %1646 = vrcp.f32 %v1058_v34  ;;  %v995_v34 = vmul.f32 1.442695, %v875_v2 }
 0x353   : > { %1648 = vpow2.f32 %v991_v45  ;;  %v2847_v45 = vld [vmem:[#allocation13_spill] sm:$0xff] }
 0x354   : > { %814 = vmax.xlane.f32.xlu0 %v813_v62  ;;  %1650 = vpow2.f32 %v993_v10  ;;  %v865_v57 = vsub.f32 %v2847_v45, %v2337_v46  ;;  %v866_v62 = vsub.f32 %v2848_v22, %v2337_v46  ;;  %v997_v10 = vmul.f32 1.442695, %v876_v3  ;;  %v2450_v46 = vpop.f32.mrf.mxu2  ;;  %v2452_v3 = vpop.f32.mrf.mxu3 }
 0x355   : > { %1652 = vpow2.f32 %v995_v34 }
 0x356   : > { %v975_v45 = vmul.f32 1.442695, %v865_v57  ;;  %v977_v2 = vmul.f32 1.442695, %v866_v62  ;;  %1654 = vpow2.f32 %v997_v10 }
 0x358   : > { %v1647_v29 = vpop.eup %1646  ;;  %1090 = vadd.xlane.f32.xlu2 %v1089_v49  ;;  %1656 = vpow2.f32 %v975_v45  ;;  %v816_v49 = vmax.f32 %v2450_v46, %v2452_v3 }
 0x359   : > { %v1169_v32 = vmul.f32 %v1647_v29, %v2268_v16  ;;  %v1170_v40 = vmul.f32 %v1647_v29, %v2270_v17  ;;  %v2444_v63 = vpop.eup %1648  ;;  %v2456_v17 = vpop.xlane.xlu0 %1036  ;;  %1658 = vpow2.f32 %v977_v2 }
 0x35a   : > { %2849 = vst [vmem:[#allocation13_spill] sm:$0xff] %v2444_v63  ;;  %v2448_v56 = vpop.eup %1650 }
 0x35b   : > { %2850 = vst [vmem:[#allocation14_spill] sm:$0xff] %v2448_v56  ;;  %1203 = vmatpush.xpose.msrb.mxu0 %v1169_v32  ;;  %1232 = vmatpush.xpose.msrb.mxu1 %v1170_v40  ;;  %v1092_v16 = vadd.f32 %v2448_v56, %v2444_v63  ;;  %v2460_v29 = vpop.eup %1652  ;;  %v857_v56 = vsub.f32 %v2106_v54, %v2346_v53 }
 0x35c   : > { %1054 = vadd.xlane.f32.xlu0 %v1053_v44  ;;  %2851 = vst [vmem:[#allocation26_spill] sm:$0xff] %v2460_v29  ;;  %v2462_v44 = vpop.eup %1654 }
 0x35d   : > { %2852 = vst [vmem:[#allocation27_spill] sm:$0xff] %v2462_v44  ;;  %v1095_v34 = vadd.f32 %v2462_v44, %v2460_v29  ;;  %v858_v29 = vsub.f32 %v2108_v55, %v2346_v53 }
 0x35e   : > { %v2464_v57 = vpop.eup %1656 }
 0x35f   : > { %2853 = vst [vmem:[#allocation28_spill] sm:$0xff] %v2464_v57  ;;  %v2468_v22 = vpop.eup %1658 }
 0x360   : > { %1093 = vadd.xlane.f32.xlu2 %v1092_v16  ;;  %2854 = vst [vmem:[#allocation29_spill] sm:$0xff] %v2468_v22  ;;  %v1080_v10 = vadd.f32 %v2468_v22, %v2464_v57 }
 0x361   : > { %v2470_v62 = vpop.xlane.xlu0 %1033 }
 0x364   : > { %817 = vmax.xlane.f32.xlu0 %v816_v49 }
 0x368   : > { %1096 = vadd.xlane.f32.xlu2 %v1095_v34 }
 0x369   : > { %v2474_v32 = vpop.xlane.xlu0 %775 }
 0x36a   : > { %2855 = vst [vmem:[#allocation30_spill] sm:$0xff] %v2474_v32  ;;  %v209_v32 = vld [vmem:[%s2760_s1 + $0x20] sm:$0xff] }
 0x36c   : > { %1081 = vadd.xlane.f32.xlu0 %v1080_v10  ;;  %v208_v10 = vld [vmem:[%s2760_s1 + $0x18] sm:$0xff] }
 0x36d   : > { %1433 = vmatmul.msk.f32.gmra.mxu0 %vm247_vm0, %v208_v10  ;;  %1439 = vmatmul.msk.f32.gmra.mxu1 %vm247_vm0, %v208_v10  ;;  %v959_v10 = vmul.f32 1.442695, %v857_v56 }
 0x371   : > { %v2476_v40 = vpop.xlane.xlu0 %1027 }
 0x375   : > { %1434 = vmatmul.msk.f32.gmra.mxu0 %vm247_vm0, %v209_v32  ;;  %1440 = vmatmul.msk.f32.gmra.mxu1 %vm247_vm0, %v209_v32  ;;  %v1049_v32 = vpop.xlane.xlu1 %1048 }
 0x379   : > { %v2478_v45 = vpop.xlane.xlu0 %1024 }
 0x381   : > { %v2480_v2 = vpop.xlane.xlu0 %1021 }
 0x389   : > { %v2482_v16 = vpop.xlane.xlu0 %1018 }
 0x391   : > { %v2484_v49 = vpop.xlane.xlu0 %1015 }
 0x399   : > { %v2486_v7 = vpop.xlane.xlu0 %1012 }
 0x3a1   : > { %v2488_v34 = vpop.permute.xlu0 %229 }
 0x3bf   : > { %v812_v22 = vpop.xlane.xlu0 %811 }
 0x3c0   : > { %v877_v57 = vsub.f32 %v2388_v59, %v812_v22  ;;  %v878_v36 = vsub.f32 %v2390_v42, %v812_v22  ;;  %v961_v59 = vmul.f32 1.442695, %v858_v29 }
 0x3c2   : > { %v999_v63 = vmul.f32 1.442695, %v877_v57  ;;  %v1001_v44 = vmul.f32 1.442695, %v878_v36 }
 0x3c4   : > { %1660 = vpow2.f32 %v999_v63 }
 0x3c5   : > { %1662 = vpow2.f32 %v1001_v44 }
 0x3c6   : > { %1664 = vpow2.f32 %v959_v10 }
 0x3c7   : > { %v815_v42 = vpop.xlane.xlu0 %814  ;;  %1666 = vpow2.f32 %v961_v59 }
 0x3c8   : > { %v879_v54 = vsub.f32 %v2414_v14, %v815_v42  ;;  %v880_v36 = vsub.f32 %v2416_v61, %v815_v42 }
 0x3ca   : > { %v2508_v57 = vpop.eup %1660  ;;  %v1003_v55 = vmul.f32 1.442695, %v879_v54  ;;  %v1005_v53 = vmul.f32 1.442695, %v880_v36 }
 0x3cb   : > { %v2510_v22 = vpop.eup %1662 }
 0x3cc   : > { %1668 = vpow2.f32 %v1003_v55  ;;  %v1098_v63 = vadd.f32 %v2510_v22, %v2508_v57  ;;  %v2514_v29 = vpop.eup %1664 }
 0x3cd   : > { %1670 = vpow2.f32 %v1005_v53  ;;  %v2516_v14 = vpop.eup %1666 }
 0x3ce   : > { %1099 = vadd.xlane.f32.xlu2 %v1098_v63  ;;  %2856 = vst [vmem:[#allocation31_spill] sm:$0xff] %v2516_v14  ;;  %v1068_v10 = vadd.f32 %v2516_v14, %v2514_v29 }
 0x3cf   : > { %v1055_v56 = vpop.xlane.xlu0 %1054 }
 0x3d0   : > { %1672 = vrcp.f32 %v1055_v56 }
 0x3d1   : > { %1674 = vrcp.f32 %v2402_v25 }
 0x3d2   : > { %v2518_v61 = vpop.eup %1668  ;;  %1676 = vrcp.f32 %v1049_v32 }
 0x3d3   : > { %v2521_v44 = vpop.eup %1670  ;;  %1678 = vrcp.f32 %v2380_v51 }
 0x3d4   : > { %v1101_v59 = vadd.f32 %v2521_v44, %v2518_v61 }
 0x3d6   : > { %v1673_v42 = vpop.eup %1672  ;;  %1069 = vadd.xlane.f32.xlu2 %v1068_v10  ;;  %1102 = vadd.xlane.f32.xlu0 %v1101_v59 }
 0x3d7   : > { %v818_v54 = vpop.xlane.xlu0 %817  ;;  %v1167_v36 = vmul.f32 %v1673_v42, %v2432_v48  ;;  %v1168_v55 = vmul.f32 %v1673_v42, %v2436_v58  ;;  %v1675_v53 = vpop.eup %1674 }
 0x3d8   : > { %v881_v25 = vsub.f32 %v2450_v46, %v818_v54  ;;  %v882_v63 = vsub.f32 %v2452_v3, %v818_v54  ;;  %v1165_v32 = vmul.f32 %v1675_v53, %v2256_v41  ;;  %v1166_v10 = vmul.f32 %v1675_v53, %v2258_v33  ;;  %v1677_v59 = vpop.eup %1676 }
 0x3d9   : > { %1204 = vmatpush.xpose.msrb.mxu0 %v1167_v36  ;;  %1233 = vmatpush.xpose.msrb.mxu1 %v1168_v55  ;;  %v1163_v48 = vmul.f32 %v1677_v59, %v2180_v35  ;;  %v1164_v58 = vmul.f32 %v1677_v59, %v2186_v18  ;;  %v1679_v46 = vpop.eup %1678  ;;  %v214_v35 = vld [vmem:[%s2761_s2 + $0x18] sm:$0xff] }
 0x3da   : > { %v1007_v56 = vmul.f32 1.442695, %v881_v25  ;;  %v1009_v14 = vmul.f32 1.442695, %v882_v63  ;;  %v1161_v33 = vmul.f32 %v1679_v46, %v2190_v15  ;;  %v1162_v3 = vmul.f32 %v1679_v46, %v2194_v30  ;;  %v210_v30 = vld [vmem:[%s2760_s1 + $0x28] sm:$0xff]  ;;  %v2859_v46 = vld [vmem:[#allocation22_spill] sm:$0xff] }
 0x3db   : > { %1435 = vmatmul.msk.f32.gmra.mxu0 %vm247_vm0, %v210_v30  ;;  %1441 = vmatmul.msk.f32.gmra.mxu1 %vm247_vm0, %v210_v30  ;;  %v856_v25 = vsub.f32 %v2102_v50, %v2358_v23  ;;  %v2863_v30 = vld [vmem:[#allocation10_spill] sm:$0xff] }
 0x3dc   : > { %1680 = vpow2.f32 %v1007_v56 }
 0x3dd   : > { %1682 = vpow2.f32 %v1009_v14  ;;  %1205 = vmatpush.xpose.msrb.mxu0 %v1165_v32  ;;  %1234 = vmatpush.xpose.msrb.mxu1 %v1166_v10  ;;  %v2858_v32 = vld [vmem:[#allocation21_spill] sm:$0xff] }
 0x3de   : > { %1684 = vrcp.f32 %v2408_v52 }
 0x3df   : > { %1686 = vrcp.f32 %v2430_v43 }
 0x3e0   : > { %1688 = vrcp.f32 %v2456_v17 }
 0x3e1   : > { %1206 = vmatpush.xpose.msrb.mxu0 %v1163_v48  ;;  %1235 = vmatpush.xpose.msrb.mxu1 %v1164_v58  ;;  %1690 = vrcp.f32 %v2470_v62  ;;  %v289_v58 = vpop.f32.mrf.mxu0 }
 0x3e2   : > { %v2537_v51 = vpop.eup %1680  ;;  %1692 = vrcp.f32 %v2370_v39 }
 0x3e3   : > { %v2540_v41 = vpop.eup %1682  ;;  %1694 = vrcp.f32 %v2476_v40 }
 0x3e4   : > { %v1685_v14 = vpop.eup %1684  ;;  %v1104_v52 = vadd.f32 %v2540_v41, %v2537_v51  ;;  %1696 = vrcp.f32 %v2478_v45 }
 0x3e5   : > { %1207 = vmatpush.xpose.msrb.mxu0 %v1161_v33  ;;  %1236 = vmatpush.xpose.msrb.mxu1 %v1162_v3  ;;  %v1159_v18 = vmul.f32 %v1685_v14, %v2210_v13  ;;  %v1160_v43 = vmul.f32 %v1685_v14, %v2212_v19  ;;  %v1687_v15 = vpop.eup %1686  ;;  %1698 = vrcp.f32 %v2480_v2  ;;  %v855_v2 = vsub.f32 %v2100_v47, %v2358_v23  ;;  %v324_v3 = vpop.f32.mrf.mxu1 }
 0x3e6   : > { %1105 = vadd.xlane.f32.xlu2 %v1104_v52  ;;  %v1157_v17 = vmul.f32 %v1687_v15, %v2228_v21  ;;  %v1158_v42 = vmul.f32 %v1687_v15, %v2232_v11  ;;  %v1689_v13 = vpop.eup %1688  ;;  %1700 = vrcp.f32 %v2482_v16  ;;  %v2607_v14 = vadd.f32 %v289_v58, %v2488_v34  ;;  %v2865_v58 = vld [vmem:[#allocation27_spill] sm:$0xff] }
 0x3e7   : > { %v1155_v19 = vmul.f32 %v1689_v13, %v2242_v5  ;;  %v1156_v54 = vmul.f32 %v1689_v13, %v2244_v27  ;;  %v1691_v36 = vpop.eup %1690  ;;  %v2569_v27 = vpop.xlane.xlu2 %1072  ;;  %1702 = vrcp.f32 %v2484_v49  ;;  %v955_v63 = vmul.f32 1.442695, %v855_v2 }
 0x3e8   : > { %v1153_v21 = vmul.f32 %v1691_v36, %v2252_v24  ;;  %v1154_v11 = vmul.f32 %v1691_v36, %v2254_v0  ;;  %v1693_v62 = vpop.eup %1692  ;;  %v215_v24 = vld [vmem:[%s2761_s2 + $0x20] sm:$0xff]  ;;  %1704 = vrcp.f32 %v2486_v7  ;;  %v851_v49 = vsub.f32 %v2088_v37, %v2382_v31 }
 0x3e9   : > { %1208 = vmatpush.xpose.msrb.mxu0 %v1159_v18  ;;  %1237 = vmatpush.xpose.msrb.mxu1 %v1160_v43  ;;  %v1151_v39 = vmul.f32 %v1693_v62, %v2224_v26  ;;  %v1152_v5 = vmul.f32 %v1693_v62, %v2226_v20  ;;  %v1695_v55 = vpop.eup %1694  ;;  %1706 = vpow2.f32 %v955_v63  ;;  %v2862_v18 = vld [vmem:[#allocation9_spill] sm:$0xff]  ;;  %v2614_v15 = vadd.f32 %v324_v3, %v2488_v34 }
 0x3ea   : > { %234 = vperm.xlu0 %1556, %v214_v35   ;;  %v1149_v0 = vmul.f32 %v1695_v55, %v2280_v8  ;;  %v1150_v40 = vmul.f32 %v1695_v55, %v2282_v9  ;;  %v1697_v45 = vpop.eup %1696  ;;  %v947_v59 = vmul.f32 1.442695, %v851_v49  ;;  %v2861_v35 = vld [vmem:[#allocation30_spill] sm:$0xff]  ;;  %v216_v55 = vld [vmem:[%s2761_s2 + $0x28] sm:$0xff] }
 0x3eb   : > { %v1147_v26 = vmul.f32 %v1697_v45, %v2290_v1  ;;  %v1148_v20 = vmul.f32 %v1697_v45, %v2292_v12  ;;  %v1699_v53 = vpop.eup %1698  ;;  %v957_v12 = vmul.f32 1.442695, %v856_v25  ;;  %v853_v43 = vsub.f32 %v2862_v18, %v2861_v35  ;;  %v1082_v45 = vpop.xlane.xlu0 %1081 }
 0x3ec   : > { %v1145_v9 = vmul.f32 %v1699_v53, %v2300_v4  ;;  %v1146_v16 = vmul.f32 %v1699_v53, %v2302_v60  ;;  %v1701_v1 = vpop.eup %1700  ;;  %v852_v4 = vsub.f32 %v2090_v38, %v2382_v31  ;;  %v2857_v60 = vld [vmem:[#allocation6_spill] sm:$0xff]  ;;  %v2860_v31 = vld [vmem:[#allocation23_spill] sm:$0xff]  ;;  %v292_v53 = vpop.f32.mrf.mxu0 }
 0x3ed   : > { %1209 = vmatpush.xpose.msrb.mxu0 %v1157_v17  ;;  %1238 = vmatpush.xpose.msrb.mxu1 %v1158_v42  ;;  %v1143_v47 = vmul.f32 %v1701_v1, %v2310_v28  ;;  %v1144_v50 = vmul.f32 %v1701_v1, %v2312_v6  ;;  %v1703_v23 = vpop.eup %1702  ;;  %1708 = vpow2.f32 %v957_v12  ;;  %v854_v17 = vsub.f32 %v2863_v30, %v2861_v35  ;;  %v327_v2 = vpop.f32.mrf.mxu1  ;;  %v2869_v35 = vld [vmem:[#allocation8_spill] sm:$0xff]  ;;  %v2870_v30 = vld [vmem:[#allocation19_spill] sm:$0xff] }
 0x3ee   : > { %v1141_v56 = vmul.f32 %v1703_v23, %v2857_v60  ;;  %v1142_v10 = vmul.f32 %v1703_v23, %v2858_v32  ;;  %v1705_v7 = vpop.eup %1704  ;;  %v949_v28 = vmul.f32 1.442695, %v852_v4  ;;  %1710 = vpow2.f32 %v947_v59 }
 0x3ef   : > { %v2585_v8 = vpop.xlane.xlu2 %1075  ;;  %v2600_v6 = vpop.eup %1706  ;;  %v1139_v38 = vmul.f32 %v1705_v7, %v2859_v46  ;;  %v1140_v33 = vmul.f32 %v1705_v7, %v2860_v31  ;;  %v953_v36 = vmul.f32 1.442695, %v854_v17 }
 0x3f0   : > { %1712 = vpow2.f32 %v949_v28  ;;  %v2864_v28 = vld [vmem:[#allocation26_spill] sm:$0xff] }
 0x3f1   : > { %1210 = vmatpush.xpose.msrb.mxu0 %v1155_v19  ;;  %1239 = vmatpush.xpose.msrb.mxu1 %v1156_v54  ;;  %v951_v19 = vmul.f32 1.442695, %v853_v43 }
 0x3f3   : > { %v2602_v37 = vpop.eup %1708  ;;  %1714 = vpow2.f32 %v951_v19  ;;  %v2871_v19 = vld [vmem:[#allocation20_spill] sm:$0xff] }
 0x3f4   : > { %v1065_v52 = vadd.f32 %v2602_v37, %v2600_v6  ;;  %v2620_v42 = vpop.eup %1710  ;;  %1716 = vpow2.f32 %v953_v36  ;;  %v295_v12 = vpop.f32.mrf.mxu0 }
 0x3f5   : > { %1211 = vmatpush.xpose.msrb.mxu0 %v1153_v21  ;;  %1240 = vmatpush.xpose.msrb.mxu1 %v1154_v11  ;;  %v330_v23 = vpop.f32.mrf.mxu1 }
 0x3f6   : > { %v2622_v13 = vpop.eup %1712 }
 0x3f7   : > { %v2598_v48 = vpop.xlane.xlu2 %1078  ;;  %v1059_v34 = vadd.f32 %v2622_v13, %v2620_v42 }
 0x3f9   : > { %1212 = vmatpush.xpose.msrb.mxu0 %v1151_v39  ;;  %1241 = vmatpush.xpose.msrb.mxu1 %v1152_v5  ;;  %v2628_v21 = vpop.eup %1714 }
 0x3fa   : > { %v2630_v62 = vpop.eup %1716 }
 0x3fb   : > { %v1062_v39 = vadd.f32 %v2630_v62, %v2628_v21 }
 0x3fd   : > { %1213 = vmatpush.xpose.msrb.mxu0 %v1149_v0  ;;  %1242 = vmatpush.xpose.msrb.mxu1 %v1150_v40 }
 0x3fe   : > { %239 = vperm.xlu2 %1557, %v215_v24  }
 0x3ff   : > { %v2624_v54 = vpop.xlane.xlu2 %1084 }
 0x401   : > { %1214 = vmatpush.xpose.msrb.mxu0 %v1147_v26  ;;  %1243 = vmatpush.xpose.msrb.mxu1 %v1148_v20 }
 0x405   : > { %1215 = vmatpush.xpose.msrb.mxu0 %v1145_v9  ;;  %1244 = vmatpush.xpose.msrb.mxu1 %v1146_v16 }
 0x407   : > { %v1088_v11 = vpop.xlane.xlu2 %1087 }
 0x409   : > { %1216 = vmatpush.xpose.msrb.mxu0 %v1143_v47  ;;  %1245 = vmatpush.xpose.msrb.mxu1 %v1144_v50 }
 0x40d   : > { %1217 = vmatpush.xpose.msrb.mxu0 %v1141_v56  ;;  %1246 = vmatpush.xpose.msrb.mxu1 %v1142_v10 }
 0x40f   : > { %v1091_v5 = vpop.xlane.xlu2 %1090 }
 0x411   : > { %1218 = vmatpush.xpose.msrb.mxu0 %v1139_v38  ;;  %1247 = vmatpush.xpose.msrb.mxu1 %v1140_v33  ;;  %v2866_v38 = vld [vmem:[#allocation13_spill] sm:$0xff]  ;;  %v2867_v33 = vld [vmem:[#allocation14_spill] sm:$0xff] }
 0x414   : > { %1066 = vadd.xlane.f32.xlu0 %v1065_v52  ;;  %1219 = vmatmul.f32.vlgmr.msrb.gmra.mxu0 %v2607_v14 }
 0x415   : > { %1248 = vmatmul.f32.vlgmr.msrb.gmra.mxu1 %v2614_v15 }
 0x417   : > { %v1094_v24 = vpop.xlane.xlu2 %1093 }
 0x41c   : > { %1060 = vadd.xlane.f32.xlu0 %v1059_v34 }
 0x41f   : > { %v1097_v0 = vpop.xlane.xlu2 %1096 }
 0x427   : > { %1063 = vadd.xlane.f32.xlu2 %v1062_v39 }
 0x430   : > { %244 = vperm.xlu0 %1556, %v216_v55  }
 0x441   : > { %v1100_v40 = vpop.xlane.xlu2 %1099 }
 0x449   : > { %v2637_v26 = vpop.xlane.xlu2 %1069  ;;  %v1103_v20 = vpop.xlane.xlu0 %1102 }
 0x459   : > { %v1106_v25 = vpop.xlane.xlu2 %1105 }
 0x45a   : > { %1718 = vrcp.f32 %v1106_v25 }
 0x45b   : > { %1720 = vrcp.f32 %v1103_v20 }
 0x45c   : > { %v235_v9 = vpop.permute.xlu0 %234  ;;  %1722 = vrcp.f32 %v1100_v40  ;;  %v2875_v40 = vld [vmem:[#allocation29_spill] sm:$0xff] }
 0x45d   : > { %v2639_v16 = vadd.f32 %v292_v53, %v235_v9  ;;  %v2641_v1 = vadd.f32 %v327_v2, %v235_v9  ;;  %1724 = vrcp.f32 %v1097_v0  ;;  %v2876_v53 = vld [vmem:[#allocation15_spill] sm:$0xff]  ;;  %v2877_v2 = vld [vmem:[#allocation16_spill] sm:$0xff] }
 0x45e   : > { %1726 = vrcp.f32 %v1094_v24  ;;  %v2874_v24 = vld [vmem:[#allocation28_spill] sm:$0xff] }
 0x45f   : > { %1222 = vmatmul.f32.gmra.mxu0 %v2639_v16  ;;  %1251 = vmatmul.f32.gmra.mxu1 %v2641_v1  ;;  %1728 = vrcp.f32 %v1091_v5 }
 0x460   : > { %v1719_v63 = vpop.eup %1718  ;;  %1730 = vrcp.f32 %v1088_v11  ;;  %v2872_v11 = vld [vmem:[#allocation17_spill] sm:$0xff] }
 0x461   : > { %v1201_v47 = vmul.f32 %v1719_v63, %v2537_v51  ;;  %v1202_v50 = vmul.f32 %v1719_v63, %v2540_v41  ;;  %v240_v49 = vpop.permute.xlu2 %239  ;;  %v1721_v4 = vpop.eup %1720  ;;  %1732 = vrcp.f32 %v2624_v54  ;;  %v2873_v54 = vld [vmem:[#allocation18_spill] sm:$0xff] }
 0x462   : > { %v2647_v60 = vadd.f32 %v295_v12, %v240_v49  ;;  %v2649_v56 = vadd.f32 %v330_v23, %v240_v49  ;;  %v1199_v32 = vmul.f32 %v1721_v4, %v2518_v61  ;;  %v1200_v10 = vmul.f32 %v1721_v4, %v2521_v44  ;;  %v1723_v7 = vpop.eup %1722  ;;  %v298_v63 = vpop.f32.mrf.mxu0  ;;  %v2879_v23 = vld [vmem:[#allocation25_spill] sm:$0xff] }
 0x463   : > { %1261 = vmatpush.xpose.msra.mxu0 %v1201_v47  ;;  %1290 = vmatpush.xpose.msra.mxu1 %v1202_v50  ;;  %v1197_v51 = vmul.f32 %v1723_v7, %v2508_v57  ;;  %v1198_v41 = vmul.f32 %v1723_v7, %v2510_v22  ;;  %v1725_v59 = vpop.eup %1724  ;;  %v2868_v57 = vld [vmem:[#allocation7_spill] sm:$0xff]  ;;  %1734 = vrcp.f32 %v1082_v45  ;;  %v333_v12 = vpop.f32.mrf.mxu1  ;;  %v2878_v47 = vld [vmem:[#allocation12_spill] sm:$0xff] }
 0x464   : > { %v1195_v61 = vmul.f32 %v1725_v59, %v2864_v28  ;;  %v1196_v44 = vmul.f32 %v1725_v59, %v2865_v58  ;;  %v1727_v46 = vpop.eup %1726  ;;  %1736 = vrcp.f32 %v2598_v48  ;;  %v2681_v59 = vstv %s1319_s14 }
 0x465   : > { %v1193_v31 = vmul.f32 %v1727_v46, %v2866_v38  ;;  %v1194_v3 = vmul.f32 %v1727_v46, %v2867_v33  ;;  %v1729_v52 = vpop.eup %1728  ;;  %1738 = vrcp.f32 %v2585_v8 }
 0x466   : > { %v1191_v22 = vmul.f32 %v1729_v52, %v2868_v57  ;;  %v1192_v18 = vmul.f32 %v1729_v52, %v2869_v35  ;;  %v1731_v43 = vpop.eup %1730  ;;  %1740 = vrcp.f32 %v2569_v27  ;;  %v2880_v27 = vld [vmem:[#allocation24_spill] sm:$0xff] }
 0x467   : > { %1225 = vmatmul.f32.gmra.mxu0 %v2647_v60  ;;  %1254 = vmatmul.f32.gmra.mxu1 %v2649_v56  ;;  %v1189_v17 = vmul.f32 %v1731_v43, %v2870_v30  ;;  %v1190_v36 = vmul.f32 %v1731_v43, %v2871_v19  ;;  %v1733_v34 = vpop.eup %1732  ;;  %1742 = vrcp.f32 %v2637_v26 }
 0x468   : > { %1262 = vmatpush.xpose.msra.mxu0 %v1199_v32  ;;  %1291 = vmatpush.xpose.msra.mxu1 %v1200_v10  ;;  %v1187_v39 = vmul.f32 %v1733_v34, %v2872_v11  ;;  %v1188_v5 = vmul.f32 %v1733_v34, %v2873_v54  ;;  %v2881_v10 = vld [vmem:[#allocation11_spill] sm:$0xff] }
 0x469   : > { %v1735_v55 = vpop.eup %1734 }
 0x46a   : > { %v1185_v0 = vmul.f32 %v1735_v55, %v2874_v24  ;;  %v1186_v45 = vmul.f32 %v1735_v55, %v2875_v40  ;;  %v1737_v20 = vpop.eup %1736  ;;  %v1753_v55 = vld [vmem:[%s1909_s8 + $0x30] sm:$0xff] }
 0x46b   : > { %v1183_v48 = vmul.f32 %v1737_v20, %v2876_v53  ;;  %v1184_v25 = vmul.f32 %v1737_v20, %v2877_v2  ;;  %v1739_v9 = vpop.eup %1738  ;;  %v1754_v53 = vld [vmem:[%s1909_s8 + $0x8] sm:$0xff] }
 0x46c   : > { %1263 = vmatpush.xpose.msra.mxu0 %v1197_v51  ;;  %1292 = vmatpush.xpose.msra.mxu1 %v1198_v41  ;;  %v1181_v50 = vmul.f32 %v1739_v9, %v2878_v47  ;;  %v1182_v49 = vmul.f32 %v1739_v9, %v2879_v23  ;;  %v1741_v4 = vpop.eup %1740 }
 0x46d   : > { %v1179_v32 = vmul.f32 %v1741_v4, %v2880_v27  ;;  %v1180_v7 = vmul.f32 %v1741_v4, %v2881_v10  ;;  %v1743_v51 = vpop.eup %1742  ;;  %v1756_v4 = vld [vmem:[%s1909_s8 + $0x28] sm:$0xff] }
 0x46e   : > { %v1177_v28 = vmul.f32 %v1743_v51, %v2514_v29 }
 0x470   : > { %1264 = vmatpush.xpose.msra.mxu0 %v1195_v61  ;;  %1293 = vmatpush.xpose.msra.mxu1 %v1196_v44  ;;  %v2882_v61 = vld [vmem:[#allocation31_spill] sm:$0xff] }
 0x471   : > { %v1178_v58 = vmul.f32 %v1743_v51, %v2882_v61 }
 0x474   : > { %1265 = vmatpush.xpose.msra.mxu0 %v1193_v31  ;;  %1294 = vmatpush.xpose.msra.mxu1 %v1194_v3  ;;  %v1750_v3 = vld [vmem:[%s1909_s8] sm:$0xff] }
 0x478   : > { %1266 = vmatpush.xpose.msra.mxu0 %v1191_v22  ;;  %1295 = vmatpush.xpose.msra.mxu1 %v1192_v18 }
 0x47c   : > { %1267 = vmatpush.xpose.msra.mxu0 %v1189_v17  ;;  %1296 = vmatpush.xpose.msra.mxu1 %v1190_v36 }
 0x480   : > { %1268 = vmatpush.xpose.msra.mxu0 %v1187_v39  ;;  %1297 = vmatpush.xpose.msra.mxu1 %v1188_v5 }
 0x484   : > { %1269 = vmatpush.xpose.msra.mxu0 %v1185_v0  ;;  %1298 = vmatpush.xpose.msra.mxu1 %v1186_v45 }
 0x487   : > { %v1067_v8 = vpop.xlane.xlu0 %1066 }
 0x488   : > { %1270 = vmatpush.xpose.msra.mxu0 %v1183_v48  ;;  %1299 = vmatpush.xpose.msra.mxu1 %v1184_v25  ;;  %1744 = vrcp.f32 %v1067_v8 }
 0x48c   : > { %1271 = vmatpush.xpose.msra.mxu0 %v1181_v50  ;;  %1300 = vmatpush.xpose.msra.mxu1 %v1182_v49 }
 0x48e   : > { %v1745_v44 = vpop.eup %1744 }
 0x48f   : > { %v1175_v31 = vmul.f32 %v1745_v44, %v2600_v6  ;;  %v1176_v33 = vmul.f32 %v1745_v44, %v2602_v37  ;;  %v1061_v29 = vpop.xlane.xlu0 %1060 }
 0x490   : > { %1272 = vmatpush.xpose.msra.mxu0 %v1179_v32  ;;  %1301 = vmatpush.xpose.msra.mxu1 %v1180_v7 }
 0x491   : > { %v1220_v26 = vpop.f32.mrf.mxu0 }
 0x492   : > { %v1249_v41 = vpop.f32.mrf.mxu1 }
 0x493   : > { %v1250_v46 = vadd.f32 %v1249_v41, %v1220_v26  ;;  %v1757_v26 = vld [vmem:[%s1909_s8 + $0x38] sm:$0xff] }
 0x494   : > { %1273 = vmatpush.xpose.msra.mxu0 %v1177_v28  ;;  %1302 = vmatpush.xpose.msra.mxu1 %v1178_v58 }
 0x495   : > { %v1321_v38 = vmul.f32 %v2681_v59, %v1250_v46 }
 0x497   : > { %v1329_v52 = vadd.f32 %v1750_v3, %v1321_v38 }
 0x498   : > { %1274 = vmatpush.xpose.msra.mxu0 %v1175_v31  ;;  %1303 = vmatpush.xpose.msra.mxu1 %v1176_v33 }
 0x499   : > { %1337 = vst [vmem:[%s2691_s21] sm:$0xff] %v1329_v52 }
 0x49a   : > { %v1064_v57 = vpop.xlane.xlu2 %1063 }
 0x49b   : > { %1746 = vrcp.f32 %v1064_v57 }
 0x49c   : > { %1748 = vrcp.f32 %v1061_v29 }
 0x4a1   : > { %v1747_v22 = vpop.eup %1746 }
 0x4a2   : > { %v245_v35 = vpop.permute.xlu0 %244  ;;  %v1173_v18 = vmul.f32 %v1747_v22, %v2628_v21  ;;  %v1174_v6 = vmul.f32 %v1747_v22, %v2630_v62  ;;  %v1749_v43 = vpop.eup %1748  ;;  %v1751_v62 = vld [vmem:[%s1909_s8 + $0x10] sm:$0xff] }
 0x4a3   : > { %v299_v37 = vadd.f32 %v298_v63, %v245_v35  ;;  %v334_v30 = vadd.f32 %v333_v12, %v245_v35  ;;  %v1171_v17 = vmul.f32 %v1749_v43, %v2620_v42  ;;  %v1172_v19 = vmul.f32 %v1749_v43, %v2622_v13  ;;  %v1755_v12 = vld [vmem:[%s1909_s8 + $0x18] sm:$0xff] }
 0x4a4   : > { %1275 = vmatpush.xpose.msra.mxu0 %v1173_v18  ;;  %1304 = vmatpush.xpose.msra.mxu1 %v1174_v6 }
 0x4a5   : > { %1228 = vmatmul.f32.gmra.mxu0 %v299_v37  ;;  %1257 = vmatmul.f32.gmra.mxu1 %v334_v30 }
 0x4a8   : > { %1276 = vmatpush.xpose.msra.mxu0 %v1171_v17  ;;  %1305 = vmatpush.xpose.msra.mxu1 %v1172_v19 }
 0x4ad   : > { %1277 = vmatmul.f32.vlgmr.msra.gmra.mxu0 %v2607_v14  ;;  %1306 = vmatmul.f32.vlgmr.msra.gmra.mxu1 %v2614_v15 }
 0x4b5   : > { %1280 = vmatmul.f32.gmra.mxu0 %v2639_v16  ;;  %1309 = vmatmul.f32.gmra.mxu1 %v2641_v1 }
 0x4bd   : > { %1283 = vmatmul.f32.gmra.mxu0 %v2647_v60  ;;  %1312 = vmatmul.f32.gmra.mxu1 %v2649_v56  ;;  %v1752_v56 = vld [vmem:[%s1909_s8 + $0x20] sm:$0xff] }
 0x4c5   : > { %1286 = vmatmul.f32.gmra.mxu0 %v299_v37  ;;  %1315 = vmatmul.f32.gmra.mxu1 %v334_v30 }
 0x4dc   : > { %v1223_v42 = vpop.f32.mrf.mxu0  ;;  %v1252_v13 = vpop.f32.mrf.mxu1 }
 0x4dd   : > { %v1253_v21 = vadd.f32 %v1252_v13, %v1223_v42 }
 0x4df   : > { %v1323_v14 = vmul.f32 %v2681_v59, %v1253_v21 }
 0x4e1   : > { %v1331_v15 = vadd.f32 %v1751_v62, %v1323_v14 }
 0x4e3   : > { %1339 = vst [vmem:[%s2691_s21 + $0x10] sm:$0xff] %v1331_v15 }
 0x4e4   : > { %v1226_v16 = vpop.f32.mrf.mxu0  ;;  %v1255_v1 = vpop.f32.mrf.mxu1 }
 0x4e5   : > { %v1256_v36 = vadd.f32 %v1255_v1, %v1226_v16 }
 0x4e7   : > { %v1325_v60 = vmul.f32 %v2681_v59, %v1256_v36 }
 0x4e9   : > { %v1333_v34 = vadd.f32 %v1752_v56, %v1325_v60 }
 0x4eb   : > { %1341 = vst [vmem:[%s2691_s21 + $0x20] sm:$0xff] %v1333_v34 }
 0x522   : > { %v1229_v11 = vpop.f32.mrf.mxu0  ;;  %v1258_v39 = vpop.f32.mrf.mxu1 }
 0x523   : > { %v1259_v54 = vadd.f32 %v1258_v39, %v1229_v11 }
 0x525   : > { %v1327_v5 = vmul.f32 %v2681_v59, %v1259_v54 }
 0x527   : > { %v1335_v24 = vadd.f32 %v1753_v55, %v1327_v5 }
 0x529   : > { %1343 = vst [vmem:[%s2691_s21 + $0x30] sm:$0xff] %v1335_v24 }
 0x52a   : > { %v1278_v0 = vpop.f32.mrf.mxu0  ;;  %v1307_v40 = vpop.f32.mrf.mxu1 }
 0x52b   : > { %v1308_v45 = vadd.f32 %v1307_v40, %v1278_v0 }
 0x52d   : > { %v1322_v20 = vmul.f32 %v2681_v59, %v1308_v45 }
 0x52f   : > { %v1330_v48 = vadd.f32 %v1754_v53, %v1322_v20 }
 0x531   : > { %1338 = vst [vmem:[%s2691_s21 + $0x8] sm:$0xff] %v1330_v48 }
 0x532   : > { %v1281_v2 = vpop.f32.mrf.mxu0  ;;  %v1310_v25 = vpop.f32.mrf.mxu1 }
 0x533   : > { %v1311_v9 = vadd.f32 %v1310_v25, %v1281_v2 }
 0x535   : > { %v1324_v63 = vmul.f32 %v2681_v59, %v1311_v9 }
 0x537   : > { %v1332_v8 = vadd.f32 %v1755_v12, %v1324_v63 }
 0x539   : > { %1340 = vst [vmem:[%s2691_s21 + $0x18] sm:$0xff] %v1332_v8 }
 0x53a   : > { %v1284_v47 = vpop.f32.mrf.mxu0  ;;  %v1313_v50 = vpop.f32.mrf.mxu1 }
 0x53b   : > { %v1314_v23 = vadd.f32 %v1313_v50, %v1284_v47 }
 0x53d   : > { %v1326_v49 = vmul.f32 %v2681_v59, %v1314_v23 }
 0x53f   : > { %v1334_v27 = vadd.f32 %v1756_v4, %v1326_v49 }
 0x541   : > { %1342 = vst [vmem:[%s2691_s21 + $0x28] sm:$0xff] %v1334_v27 }
 0x542   : > { %v1287_v32 = vpop.f32.mrf.mxu0  ;;  %v1316_v10 = vpop.f32.mrf.mxu1 }
 0x543   : > { %v1317_v7 = vadd.f32 %v1316_v10, %v1287_v32 }
 0x545   : > { %v1328_v51 = vmul.f32 %v2681_v59, %v1317_v7 }
 0x547   : > { %v1336_v41 = vadd.f32 %v1757_v26, %v1328_v51 }
 0x549   : > { %1344 = vst [vmem:[%s2691_s21 + $0x38] sm:$0xff] %v1336_v41 }
 0x54a   : > { %1785 = shalt.err (!%p1782_p3)
}
 0x54b   : > { %s1823_s8 = smov 256   ;;  %s1824_s14 = smov 16  }
 0x54c   : > { %1513 = dma.vmem_to_hbm [thread:$0]  (%p1891_p5), %s1359_s30, 1024, %s1361_s5, %s1346_s3, %s1823_s8, %s1823_s8, %s1824_s14  }
 0x54d PF: > { %p1519_p4 = scmp.ge.s32.totalorder %s1820_s20, 2  ;;  %s1375_s15 = sand.u32 1, %s1808_s17  }
 0x54e   : > { %s1376_s16 = scalar_lea.sflag [#allocation4], %s1375_s15 }
 0x54f   : > { %p1516_p7 = pnand %p1519_p4, %p1895_p6 }
 0x551   : > { %p1517_p8 = pneg %p1516_p7 }
 0x553   : > { %1803 = dma.done.wait (%p1517_p8), %s1376_s16, 1024  }
 0x554   : > { %1805 = vsyncadd (%p1517_p8), %s1376_s16, 4294966272  ;;  %p15_p9 = scmp.ge.s32.totalorder %s1878_s22, 4   ;;  %s2883_s17 = smov %s1812_s18 }
 0x555   : > { %s2884_s18 = smov %s1816_s19  ;;  %s2885_s19 = smov %s1889_s25 }
 0x556   : > { %s2886_s20 = smov %s1878_s22  ;;  %17 = sbr.rel (!%p15_p9) target bundleno = 5 (0x5), region = 71 }
 0x55b   :  { %1382 = vsyncpa [#allocation4], 1 }
 0x55c   :  { %1384 = vsyncpa [#allocation4 + $0x1], 1 }

</bundles_post_ra>
